<compile_context>
chip_gen: v5e
topology: v5e:2x2
jax: 0.10.0
libtpu: 0.0.40
codegen_flags: <defaults>
</compile_context>

<pallas_src>
import functools

import jax
import jax.numpy as jnp
import numpy as np
from jax.experimental import pallas as pl
from jax.experimental.pallas import tpu as pltpu


# ----------------------------------------------------------------- constants --
# Geometry implied by the PyTorch module on a 28x28 Fashion-MNIST input.
_HIN = 28
_PAD1 = 3
_K1, _S1, _C1 = 8, 2, 16          # conv1: 8x8, stride 2, 16 out channels
_WPAD = _HIN + 2 * _PAD1          # 34 padded height/width
_OH1 = (_WPAD - _K1) // _S1 + 1   # 14 conv1 output H/W
_L1 = _OH1 * _C1                  # 224 conv1 lane width   (W * C, channel-last)
_LP1 = (_OH1 - 1) * _C1           # 208 pooled-conv1 lane width (13 * 16)

_K2, _S2, _C2 = 4, 2, 32          # conv2: 4x4, stride 2, 32 out channels
_OH2 = ((_OH1 - 1) - _K2) // _S2 + 1   # 5 conv2 output H/W
_L2 = _OH2 * _C2                  # 160 conv2 lane width
_NPAD = 128                       # lane padding for fc hidden / logits


# -------------------------------------------------------------------- kernel --

def _fused_cnn_kernel(x1_ref, w1_ref, b1_ref, w2_ref, b2_ref,
                      wf1_ref, bf1_ref, wf2_ref, bf2_ref, out_ref, *, bt):
    """Full CNNFashion_Mnist forward for `bt` images per grid step.

    Activation layout: rows = row_class * bt + image  (class-major, batch-minor)
      x1_ref  : (14*bt, 8*34*Cin) bf16  conv1 row-im2col (classes = conv rows
                                        0,2,...,12 then 1,3,...,13)
      w1_ref  : (8*34*Cin, 224)   bf16  conv1 block-Toeplitz weights, kh merged on K
      b1_ref  : (1, 224)          f32
      w2_ref  : (4, 208, 160)     bf16  conv2 block-Toeplitz weights (per kh)
      b2_ref  : (1, 160)          f32
      wf1_ref : (4, 128, 128)     bf16  fc1 weights (per pooled row h)
      bf1_ref : (1, 128)          f32
      wf2_ref : (128, 128)        bf16
      bf2_ref : (1, 128)          f32
      out_ref : (bt, 128)         f32   lane-padded logits (row = image)
    """
    f32, bf16 = jnp.float32, jnp.bfloat16

    # ---- conv1 (8x8 / s2 / p3): ONE batched-M dot over merged-K im2col ------
    y1 = jnp.dot(x1_ref[...], w1_ref[...], preferred_element_type=f32)
    y1 = jnp.maximum(y1 + b1_ref[...], 0.0)              # (14*bt, 224)
    y1e = y1[: 7 * bt]                                   # conv1 rows 0,2,...,12
    y1o = y1[7 * bt:]                                    # conv1 rows 1,3,...,13

    # ---- fused max_pool2d(2, stride 1): H by row-class max, W by lane shift -
    p1e = jnp.maximum(y1e, y1o)                          # pooled rows 0,2,...,12
    p1o = jnp.maximum(y1o[: 6 * bt], y1e[bt: 7 * bt])    # pooled rows 1,3,...,11
    p1e = jnp.maximum(p1e[:, :_LP1], p1e[:, _C1:]).astype(bf16)   # (7*bt, 208)
    p1o = jnp.maximum(p1o[:, :_LP1], p1o[:, _C1:]).astype(bf16)   # (6*bt, 208)

    # ---- conv2 (4x4 / s2) + bias + ReLU: 4 batched-M block-Toeplitz dots ----
    acc2 = jnp.dot(p1e[: 5 * bt], w2_ref[0], preferred_element_type=f32)
    acc2 += jnp.dot(p1o[: 5 * bt], w2_ref[1], preferred_element_type=f32)
    acc2 += jnp.dot(p1e[bt: 6 * bt], w2_ref[2], preferred_element_type=f32)
    acc2 += jnp.dot(p1o[bt: 6 * bt], w2_ref[3], preferred_element_type=f32)
    y2 = jnp.maximum(acc2 + b2_ref[...], 0.0)            # (5*bt, 160)

    # ---- fused max_pool2d(2, stride 1) -> (4*bt, 128), lane dense -----------
    p2 = jnp.maximum(y2[: 4 * bt], y2[bt: 5 * bt])
    p2 = jnp.maximum(p2[:, :_NPAD], p2[:, _C2:]).astype(bf16)     # (4*bt, 128)

    # ---- fc1 + ReLU + fc2 (NCHW flatten absorbed into wf1) ------------------
    accf = jnp.dot(p2[:bt], wf1_ref[0], preferred_element_type=f32)
    for h in range(1, 4):
        accf += jnp.dot(p2[h * bt:(h + 1) * bt], wf1_ref[h],
                        preferred_element_type=f32)
    hid = jnp.maximum(accf + bf1_ref[...], 0.0).astype(bf16)
    out_ref[...] = (jnp.dot(hid, wf2_ref[...], preferred_element_type=f32)
                    + bf2_ref[...])                      # (bt, 128) dense store


# -------------------------------------------- one-time weight preparation ----

def prepare_params(params):
    """Reshape PyTorch-layout params into kernel layout.  Call ONCE per weight set."""
    cin = params["conv1_w"].shape[1]

    # conv1 merged block-Toeplitz: W1[kh*34*Cin + v*Cin + c, j*16 + o] = w1[o,c,kh,v-2j].
    sel1 = np.zeros((_K1, _WPAD, _OH1), np.float32)
    for kw in range(_K1):
        for j in range(_OH1):
            sel1[kw, _S1 * j + kw, j] = 1.0
    m1 = jnp.einsum("wvj,ochw->hvcjo", jnp.asarray(sel1), params["conv1_w"])
    m1 = m1.reshape(_K1 * _WPAD * cin, _L1).astype(jnp.bfloat16)
    b1 = jnp.tile(params["conv1_b"], _OH1).reshape(1, _L1).astype(jnp.float32)

    # conv2 block-Toeplitz per kh: M2[kh, v*16+c, j*32+o] = w2[o,c,kh,v-2j].
    sel2 = np.zeros((_K2, _OH1 - 1, _OH2), np.float32)
    for kw in range(_K2):
        for j in range(_OH2):
            sel2[kw, _S2 * j + kw, j] = 1.0
    m2 = jnp.einsum("wvj,ochw->hvcjo", jnp.asarray(sel2), params["conv2_w"])
    m2 = m2.reshape(_K2, _LP1, _L2).astype(jnp.bfloat16)
    b2 = jnp.tile(params["conv2_b"], _OH2).reshape(1, _L2).astype(jnp.float32)

    # fc1: absorb torch .view(-1, 512) NCHW flatten order:
    #   Wf1[h, w*32+c, o] = fc1_w[o, c*16 + h*4 + w], zero-padded to 128 lanes.
    nf1 = params["fc1_w"].shape[0]
    wf1 = params["fc1_w"].reshape(nf1, _C2, 4, 4).transpose(2, 3, 1, 0)
    wf1 = jnp.pad(wf1, ((0, 0), (0, 0), (0, 0), (0, _NPAD - nf1)))
    wf1 = wf1.reshape(4, 4 * _C2, _NPAD).astype(jnp.bfloat16)
    bf1 = jnp.pad(params["fc1_b"], (0, _NPAD - nf1)).reshape(1, _NPAD)
    bf1 = bf1.astype(jnp.float32)

    ncls = params["fc2_w"].shape[0]
    wf2 = jnp.pad(params["fc2_w"].T, ((0, _NPAD - nf1), (0, _NPAD - ncls)))
    wf2 = wf2.astype(jnp.bfloat16)
    bf2 = jnp.pad(params["fc2_b"], (0, _NPAD - ncls)).reshape(1, _NPAD)
    bf2 = bf2.astype(jnp.float32)

    return {"m1": m1, "b1": b1, "m2": m2, "b2": b2,
            "wf1": wf1, "bf1": bf1, "wf2": wf2, "bf2": bf2,
            "num_classes": int(ncls)}


# --------------------------------------------------- per-call input im2col ---

def _build_lhs(x, bt, nblk):
    """Pad, channel-last, conv1 row-im2col, (class-major, batch-minor) layout, bf16."""
    bsz, cin = x.shape[0], x.shape[1]
    xp = jnp.pad(x, ((0, 0), (0, 0), (_PAD1, _PAD1), (_PAD1, _PAD1)))
    xp = xp.transpose(0, 2, 3, 1).reshape(bsz, _WPAD, _WPAD * cin)   # rows, W*C lanes
    # Output row r uses padded rows 2r..2r+7; even output rows first, then odd.
    row_idx = _S1 * np.arange(_OH1)[:, None] + np.arange(_K1)[None, :]      # (14, 8)
    order = np.concatenate([np.arange(0, _OH1, 2), np.arange(1, _OH1, 2)])
    rows = row_idx[order].reshape(-1)                                       # (112,)
    patches = xp[:, rows, :].reshape(bsz, _OH1, _K1 * _WPAD * cin)
    patches = patches.reshape(nblk, bt, _OH1, _K1 * _WPAD * cin)
    patches = patches.transpose(0, 2, 1, 3)                                 # block, class, image
    return patches.reshape(nblk * _OH1 * bt, _K1 * _WPAD * cin).astype(jnp.bfloat16)


# ------------------------------------------------------------------- forward --

@functools.partial(jax.jit, static_argnames=("batch_tile", "num_classes"))
def _forward_impl(m1, b1, m2, b2, wf1, bf1, wf2, bf2, x, *, batch_tile, num_classes):
    bsz, cin = x.shape[0], x.shape[1]

    if bsz <= batch_tile:
        bt, pad_b = bsz, 0                      # single block == full arrays
    else:
        if batch_tile % 8:
            raise ValueError("batch_tile must be a multiple of 8 for multi-block grids")
        bt = batch_tile
        pad_b = (-bsz) % bt
    if pad_b:
        x = jnp.pad(x, ((0, pad_b), (0, 0), (0, 0), (0, 0)))
    bsz_p = bsz + pad_b
    nblk = bsz_p // bt

    x1 = _build_lhs(x, bt, nblk)
    k1 = _K1 * _WPAD * cin

    operands = (x1, m1, b1, m2, b2, wf1, bf1, wf2, bf2)
    weight_bytes = sum(int(np.prod(a.shape)) * a.dtype.itemsize for a in operands[1:])
    flops_blk = (2 * (_OH1 * bt) * k1 * _L1                     # conv1
                 + 2 * _K2 * (_OH2 * bt) * _LP1 * _L2           # conv2
                 + 2 * 4 * bt * _NPAD * _NPAD                   # fc1
                 + 2 * bt * _NPAD * _NPAD)                      # fc2
    cost = pl.CostEstimate(
        flops=nblk * flops_blk, transcendentals=0,
        bytes_accessed=int(np.prod(x1.shape)) * 2 + weight_bytes + bsz_p * _NPAD * 4)

    const2 = lambda i: (0, 0)
    const3 = lambda i: (0, 0, 0)
    out = pl.pallas_call(
        functools.partial(_fused_cnn_kernel, bt=bt),
        out_shape=jax.ShapeDtypeStruct((bsz_p, _NPAD), jnp.float32),
        grid=(nblk,),
        in_specs=[
            pl.BlockSpec((_OH1 * bt, k1), lambda i: (i, 0)),   # im2col block per step
            pl.BlockSpec(m1.shape, const2),                    # weights: VMEM resident
            pl.BlockSpec(b1.shape, const2),
            pl.BlockSpec(m2.shape, const3),
            pl.BlockSpec(b2.shape, const2),
            pl.BlockSpec(wf1.shape, const3),
            pl.BlockSpec(bf1.shape, const2),
            pl.BlockSpec(wf2.shape, const2),
            pl.BlockSpec(bf2.shape, const2),
        ],
        out_specs=pl.BlockSpec((bt, _NPAD), lambda i: (i, 0)),
        compiler_params=pltpu.CompilerParams(
            dimension_semantics=("parallel",),
            vmem_limit_bytes=32 * 1024 * 1024),
        cost_estimate=cost,
    )(*operands)

    return out[:bsz, :num_classes]


def cnn_fashion_mnist_forward(prep, x, batch_tile=128):
    """Forward pass.  `prep` is the output of prepare_params (weights pre-laid-out)."""
    return _forward_impl(prep["m1"], prep["b1"], prep["m2"], prep["b2"],
                         prep["wf1"], prep["bf1"], prep["wf2"], prep["bf2"], x,
                         batch_tile=batch_tile, num_classes=prep["num_classes"])


# -------------------------------------------------------------------- params --

def init_params(key, num_channels=1, num_classes=10):
    ks = jax.random.split(key, 8)
    s = 0.05
    return {
        "conv1_w": s * jax.random.normal(ks[0], (16, num_channels, 8, 8), jnp.float32),
        "conv1_b": s * jax.random.normal(ks[1], (16,), jnp.float32),
        "conv2_w": s * jax.random.normal(ks[2], (32, 16, 4, 4), jnp.float32),
        "conv2_b": s * jax.random.normal(ks[3], (32,), jnp.float32),
        "fc1_w": s * jax.random.normal(ks[4], (32, 32 * 4 * 4), jnp.float32),
        "fc1_b": s * jax.random.normal(ks[5], (32,), jnp.float32),
        "fc2_w": s * jax.random.normal(ks[6], (num_classes, 32), jnp.float32),
        "fc2_b": s * jax.random.normal(ks[7], (num_classes,), jnp.float32),
    }


# -------------------------------------------------------- pure-JAX reference --

def reference_forward(params, x):
    dn = ("NCHW", "OIHW", "NCHW")
    y = jax.lax.conv_general_dilated(x, params["conv1_w"], (2, 2),
                                     [(3, 3), (3, 3)], dimension_numbers=dn)
    y = jax.nn.relu(y + params["conv1_b"].reshape(1, -1, 1, 1))
    y = jax.lax.reduce_window(y, -jnp.inf, jax.lax.max,
                              (1, 1, 2, 2), (1, 1, 1, 1), "VALID")
    y = jax.lax.conv_general_dilated(y, params["conv2_w"], (2, 2),
                                     [(0, 0), (0, 0)], dimension_numbers=dn)
    y = jax.nn.relu(y + params["conv2_b"].reshape(1, -1, 1, 1))
    y = jax.lax.reduce_window(y, -jnp.inf, jax.lax.max,
                              (1, 1, 2, 2), (1, 1, 1, 1), "VALID")
    y = y.reshape(y.shape[0], -1)
    y = jax.nn.relu(y @ params["fc1_w"].T + params["fc1_b"])
    y = y @ params["fc2_w"].T + params["fc2_b"]
    return y


# --------------------------------------------------------------------- main --

if __name__ == "__main__":
    key = jax.random.PRNGKey(0)
    k_param, k_x = jax.random.split(key)

    params = init_params(k_param, num_channels=1, num_classes=10)
    prep = prepare_params(params)          # one-time weight layout (hoisted out of forward)

    # Small demo batch: 2 x 1 x 28 x 28 (fc1 expects 32*4*4 => 28x28 input).
    x = jax.random.normal(k_x, (2, 1, 28, 28), jnp.float32)
    logits = jax.block_until_ready(cnn_fashion_mnist_forward(prep, x))
    assert logits.shape == (2, 10), logits.shape
    ref = jax.block_until_ready(reference_forward(params, x))
    np.testing.assert_allclose(np.asarray(logits), np.asarray(ref),
                               rtol=2e-2, atol=2e-2)

    # Multi-block grid + batch-padding path (bsz=10, batch_tile=8 -> 2 grid steps).
    x2 = jax.random.normal(jax.random.PRNGKey(1), (10, 1, 28, 28), jnp.float32)
    logits2 = jax.block_until_ready(cnn_fashion_mnist_forward(prep, x2, batch_tile=8))
    assert logits2.shape == (10, 10), logits2.shape
    ref2 = jax.block_until_ready(reference_forward(params, x2))
    np.testing.assert_allclose(np.asarray(logits2), np.asarray(ref2),
                               rtol=2e-2, atol=2e-2)

    print("KERNEL_OK")
</pallas_src>

<mosaic_0001>
module attributes {stable_mosaic.version = 11 : i64} {
  func.func @_fused_cnn_kernel(%arg0: i32, %arg1: memref<28x272xbf16, #tpu.memory_space<vmem>>, %arg2: memref<272x224xbf16, #tpu.memory_space<vmem>>, %arg3: memref<1x224xf32, #tpu.memory_space<vmem>>, %arg4: memref<4x208x160xbf16, #tpu.memory_space<vmem>>, %arg5: memref<1x160xf32, #tpu.memory_space<vmem>>, %arg6: memref<4x128x128xbf16, #tpu.memory_space<vmem>>, %arg7: memref<1x128xf32, #tpu.memory_space<vmem>>, %arg8: memref<128x128xbf16, #tpu.memory_space<vmem>>, %arg9: memref<1x128xf32, #tpu.memory_space<vmem>>, %arg10: memref<2x128xf32, #tpu.memory_space<vmem>>) attributes {dimension_semantics = [#tpu.dimension_semantics<parallel>], iteration_bounds = array<i64: 1>, scalar_prefetch = 0 : i64, scratch_operands = 0 : i64, tpu.core_type = #tpu.core_type<tc>, window_params = [{transform_indices = @transform_0, window_bounds = array<i64: 28, 272>}, {pipeline_mode = #tpu.pipeline_mode<synchronous>, transform_indices = @transform_1, window_bounds = array<i64: 272, 224>}, {pipeline_mode = #tpu.pipeline_mode<synchronous>, transform_indices = @transform_2, window_bounds = array<i64: 1, 224>}, {pipeline_mode = #tpu.pipeline_mode<synchronous>, transform_indices = @transform_3, window_bounds = array<i64: 4, 208, 160>}, {pipeline_mode = #tpu.pipeline_mode<synchronous>, transform_indices = @transform_4, window_bounds = array<i64: 1, 160>}, {pipeline_mode = #tpu.pipeline_mode<synchronous>, transform_indices = @transform_5, window_bounds = array<i64: 4, 128, 128>}, {pipeline_mode = #tpu.pipeline_mode<synchronous>, transform_indices = @transform_6, window_bounds = array<i64: 1, 128>}, {pipeline_mode = #tpu.pipeline_mode<synchronous>, transform_indices = @transform_7, window_bounds = array<i64: 128, 128>}, {pipeline_mode = #tpu.pipeline_mode<synchronous>, transform_indices = @transform_8, window_bounds = array<i64: 1, 128>}, {transform_indices = @transform_9, window_bounds = array<i64: 2, 128>}]} {
    %c0 = arith.constant 0 : index
    %c0_0 = arith.constant 0 : index
    %0 = vector.load %arg1[%c0, %c0_0] : memref<28x272xbf16, #tpu.memory_space<vmem>>, vector<28x272xbf16>
    %c0_1 = arith.constant 0 : index
    %c0_2 = arith.constant 0 : index
    %1 = vector.load %arg2[%c0_1, %c0_2] : memref<272x224xbf16, #tpu.memory_space<vmem>>, vector<272x224xbf16>
    %cst = arith.constant dense<0.000000e+00> : vector<28x224xf32>
    %2 = tpu.matmul %0, %1, %cst {dimension_numbers = #tpu.dot_dimension_numbers<[1], [0], [0], [1], [0, 0, 1, 1], [], []>} : vector<28x272xbf16>, vector<272x224xbf16>, vector<28x224xf32> -> vector<28x224xf32>
    %c0_3 = arith.constant 0 : index
    %c0_4 = arith.constant 0 : index
    %3 = vector.load %arg3[%c0_3, %c0_4] : memref<1x224xf32, #tpu.memory_space<vmem>>, vector<1x224xf32>
    %4 = vector.broadcast %3 : vector<1x224xf32> to vector<28x224xf32>
    %5 = arith.addf %2, %4 : vector<28x224xf32>
    %cst_5 = arith.constant 0.000000e+00 : f32
    %6 = vector.broadcast %cst_5 : f32 to vector<28x224xf32>
    %7 = arith.maximumf %5, %6 : vector<28x224xf32>
    %8 = vector.extract_strided_slice %7 {offsets = [0, 0], sizes = [14, 224], strides = [1, 1]} : vector<28x224xf32> to vector<14x224xf32>
    %9 = vector.extract_strided_slice %7 {offsets = [14, 0], sizes = [14, 224], strides = [1, 1]} : vector<28x224xf32> to vector<14x224xf32>
    %10 = arith.maximumf %8, %9 : vector<14x224xf32>
    %11 = vector.extract_strided_slice %9 {offsets = [0, 0], sizes = [12, 224], strides = [1, 1]} : vector<14x224xf32> to vector<12x224xf32>
    %12 = vector.extract_strided_slice %8 {offsets = [2, 0], sizes = [12, 224], strides = [1, 1]} : vector<14x224xf32> to vector<12x224xf32>
    %13 = arith.maximumf %11, %12 : vector<12x224xf32>
    %14 = vector.extract_strided_slice %10 {offsets = [0, 0], sizes = [14, 208], strides = [1, 1]} : vector<14x224xf32> to vector<14x208xf32>
    %15 = vector.extract_strided_slice %10 {offsets = [0, 16], sizes = [14, 208], strides = [1, 1]} : vector<14x224xf32> to vector<14x208xf32>
    %16 = arith.maximumf %14, %15 : vector<14x208xf32>
    %17 = arith.truncf %16 : vector<14x208xf32> to vector<14x208xbf16>
    %18 = vector.extract_strided_slice %13 {offsets = [0, 0], sizes = [12, 208], strides = [1, 1]} : vector<12x224xf32> to vector<12x208xf32>
    %19 = vector.extract_strided_slice %13 {offsets = [0, 16], sizes = [12, 208], strides = [1, 1]} : vector<12x224xf32> to vector<12x208xf32>
    %20 = arith.maximumf %18, %19 : vector<12x208xf32>
    %21 = arith.truncf %20 : vector<12x208xf32> to vector<12x208xbf16>
    %22 = vector.extract_strided_slice %17 {offsets = [0, 0], sizes = [10, 208], strides = [1, 1]} : vector<14x208xbf16> to vector<10x208xbf16>
    %c0_6 = arith.constant 0 : index
    %c0_7 = arith.constant 0 : index
    %c0_8 = arith.constant 0 : index
    %23 = vector.load %arg4[%c0_6, %c0_7, %c0_8] : memref<4x208x160xbf16, #tpu.memory_space<vmem>>, vector<1x208x160xbf16>
    %24 = vector.shape_cast %23 : vector<1x208x160xbf16> to vector<208x160xbf16>
    %cst_9 = arith.constant dense<0.000000e+00> : vector<10x160xf32>
    %25 = tpu.matmul %22, %24, %cst_9 {dimension_numbers = #tpu.dot_dimension_numbers<[1], [0], [0], [1], [0, 0, 1, 1], [], []>} : vector<10x208xbf16>, vector<208x160xbf16>, vector<10x160xf32> -> vector<10x160xf32>
    %26 = vector.extract_strided_slice %21 {offsets = [0, 0], sizes = [10, 208], strides = [1, 1]} : vector<12x208xbf16> to vector<10x208xbf16>
    %c1 = arith.constant 1 : index
    %c0_10 = arith.constant 0 : index
    %c0_11 = arith.constant 0 : index
    %27 = vector.load %arg4[%c1, %c0_10, %c0_11] : memref<4x208x160xbf16, #tpu.memory_space<vmem>>, vector<1x208x160xbf16>
    %28 = vector.shape_cast %27 : vector<1x208x160xbf16> to vector<208x160xbf16>
    %cst_12 = arith.constant dense<0.000000e+00> : vector<10x160xf32>
    %29 = tpu.matmul %26, %28, %cst_12 {dimension_numbers = #tpu.dot_dimension_numbers<[1], [0], [0], [1], [0, 0, 1, 1], [], []>} : vector<10x208xbf16>, vector<208x160xbf16>, vector<10x160xf32> -> vector<10x160xf32>
    %30 = arith.addf %25, %29 : vector<10x160xf32>
    %31 = vector.extract_strided_slice %17 {offsets = [2, 0], sizes = [10, 208], strides = [1, 1]} : vector<14x208xbf16> to vector<10x208xbf16>
    %c2 = arith.constant 2 : index
    %c0_13 = arith.constant 0 : index
    %c0_14 = arith.constant 0 : index
    %32 = vector.load %arg4[%c2, %c0_13, %c0_14] : memref<4x208x160xbf16, #tpu.memory_space<vmem>>, vector<1x208x160xbf16>
    %33 = vector.shape_cast %32 : vector<1x208x160xbf16> to vector<208x160xbf16>
    %cst_15 = arith.constant dense<0.000000e+00> : vector<10x160xf32>
    %34 = tpu.matmul %31, %33, %cst_15 {dimension_numbers = #tpu.dot_dimension_numbers<[1], [0], [0], [1], [0, 0, 1, 1], [], []>} : vector<10x208xbf16>, vector<208x160xbf16>, vector<10x160xf32> -> vector<10x160xf32>
    %35 = arith.addf %30, %34 : vector<10x160xf32>
    %36 = vector.extract_strided_slice %21 {offsets = [2, 0], sizes = [10, 208], strides = [1, 1]} : vector<12x208xbf16> to vector<10x208xbf16>
    %c3 = arith.constant 3 : index
    %c0_16 = arith.constant 0 : index
    %c0_17 = arith.constant 0 : index
    %37 = vector.load %arg4[%c3, %c0_16, %c0_17] : memref<4x208x160xbf16, #tpu.memory_space<vmem>>, vector<1x208x160xbf16>
    %38 = vector.shape_cast %37 : vector<1x208x160xbf16> to vector<208x160xbf16>
    %cst_18 = arith.constant dense<0.000000e+00> : vector<10x160xf32>
    %39 = tpu.matmul %36, %38, %cst_18 {dimension_numbers = #tpu.dot_dimension_numbers<[1], [0], [0], [1], [0, 0, 1, 1], [], []>} : vector<10x208xbf16>, vector<208x160xbf16>, vector<10x160xf32> -> vector<10x160xf32>
    %40 = arith.addf %35, %39 : vector<10x160xf32>
    %c0_19 = arith.constant 0 : index
    %c0_20 = arith.constant 0 : index
    %41 = vector.load %arg5[%c0_19, %c0_20] : memref<1x160xf32, #tpu.memory_space<vmem>>, vector<1x160xf32>
    %42 = vector.broadcast %41 : vector<1x160xf32> to vector<10x160xf32>
    %43 = arith.addf %40, %42 : vector<10x160xf32>
    %cst_21 = arith.constant 0.000000e+00 : f32
    %44 = vector.broadcast %cst_21 : f32 to vector<10x160xf32>
    %45 = arith.maximumf %43, %44 : vector<10x160xf32>
    %46 = vector.extract_strided_slice %45 {offsets = [0, 0], sizes = [8, 160], strides = [1, 1]} : vector<10x160xf32> to vector<8x160xf32>
    %47 = vector.extract_strided_slice %45 {offsets = [2, 0], sizes = [8, 160], strides = [1, 1]} : vector<10x160xf32> to vector<8x160xf32>
    %48 = arith.maximumf %46, %47 : vector<8x160xf32>
    %49 = vector.extract_strided_slice %48 {offsets = [0, 0], sizes = [8, 128], strides = [1, 1]} : vector<8x160xf32> to vector<8x128xf32>
    %50 = vector.extract_strided_slice %48 {offsets = [0, 32], sizes = [8, 128], strides = [1, 1]} : vector<8x160xf32> to vector<8x128xf32>
    %51 = arith.maximumf %49, %50 : vector<8x128xf32>
    %52 = arith.truncf %51 : vector<8x128xf32> to vector<8x128xbf16>
    %53 = vector.extract_strided_slice %52 {offsets = [0, 0], sizes = [2, 128], strides = [1, 1]} : vector<8x128xbf16> to vector<2x128xbf16>
    %c0_22 = arith.constant 0 : index
    %c0_23 = arith.constant 0 : index
    %c0_24 = arith.constant 0 : index
    %54 = vector.load %arg6[%c0_22, %c0_23, %c0_24] : memref<4x128x128xbf16, #tpu.memory_space<vmem>>, vector<1x128x128xbf16>
    %55 = vector.shape_cast %54 : vector<1x128x128xbf16> to vector<128x128xbf16>
    %cst_25 = arith.constant dense<0.000000e+00> : vector<2x128xf32>
    %56 = tpu.matmul %53, %55, %cst_25 {dimension_numbers = #tpu.dot_dimension_numbers<[1], [0], [0], [1], [0, 0, 1, 1], [], []>} : vector<2x128xbf16>, vector<128x128xbf16>, vector<2x128xf32> -> vector<2x128xf32>
    %57 = vector.extract_strided_slice %52 {offsets = [2, 0], sizes = [2, 128], strides = [1, 1]} : vector<8x128xbf16> to vector<2x128xbf16>
    %c1_26 = arith.constant 1 : index
    %c0_27 = arith.constant 0 : index
    %c0_28 = arith.constant 0 : index
    %58 = vector.load %arg6[%c1_26, %c0_27, %c0_28] : memref<4x128x128xbf16, #tpu.memory_space<vmem>>, vector<1x128x128xbf16>
    %59 = vector.shape_cast %58 : vector<1x128x128xbf16> to vector<128x128xbf16>
    %cst_29 = arith.constant dense<0.000000e+00> : vector<2x128xf32>
    %60 = tpu.matmul %57, %59, %cst_29 {dimension_numbers = #tpu.dot_dimension_numbers<[1], [0], [0], [1], [0, 0, 1, 1], [], []>} : vector<2x128xbf16>, vector<128x128xbf16>, vector<2x128xf32> -> vector<2x128xf32>
    %61 = arith.addf %56, %60 : vector<2x128xf32>
    %62 = vector.extract_strided_slice %52 {offsets = [4, 0], sizes = [2, 128], strides = [1, 1]} : vector<8x128xbf16> to vector<2x128xbf16>
    %c2_30 = arith.constant 2 : index
    %c0_31 = arith.constant 0 : index
    %c0_32 = arith.constant 0 : index
    %63 = vector.load %arg6[%c2_30, %c0_31, %c0_32] : memref<4x128x128xbf16, #tpu.memory_space<vmem>>, vector<1x128x128xbf16>
    %64 = vector.shape_cast %63 : vector<1x128x128xbf16> to vector<128x128xbf16>
    %cst_33 = arith.constant dense<0.000000e+00> : vector<2x128xf32>
    %65 = tpu.matmul %62, %64, %cst_33 {dimension_numbers = #tpu.dot_dimension_numbers<[1], [0], [0], [1], [0, 0, 1, 1], [], []>} : vector<2x128xbf16>, vector<128x128xbf16>, vector<2x128xf32> -> vector<2x128xf32>
    %66 = arith.addf %61, %65 : vector<2x128xf32>
    %67 = vector.extract_strided_slice %52 {offsets = [6, 0], sizes = [2, 128], strides = [1, 1]} : vector<8x128xbf16> to vector<2x128xbf16>
    %c3_34 = arith.constant 3 : index
    %c0_35 = arith.constant 0 : index
    %c0_36 = arith.constant 0 : index
    %68 = vector.load %arg6[%c3_34, %c0_35, %c0_36] : memref<4x128x128xbf16, #tpu.memory_space<vmem>>, vector<1x128x128xbf16>
    %69 = vector.shape_cast %68 : vector<1x128x128xbf16> to vector<128x128xbf16>
    %cst_37 = arith.constant dense<0.000000e+00> : vector<2x128xf32>
    %70 = tpu.matmul %67, %69, %cst_37 {dimension_numbers = #tpu.dot_dimension_numbers<[1], [0], [0], [1], [0, 0, 1, 1], [], []>} : vector<2x128xbf16>, vector<128x128xbf16>, vector<2x128xf32> -> vector<2x128xf32>
    %71 = arith.addf %66, %70 : vector<2x128xf32>
    %c0_38 = arith.constant 0 : index
    %c0_39 = arith.constant 0 : index
    %72 = vector.load %arg7[%c0_38, %c0_39] : memref<1x128xf32, #tpu.memory_space<vmem>>, vector<1x128xf32>
    %73 = vector.broadcast %72 : vector<1x128xf32> to vector<2x128xf32>
    %74 = arith.addf %71, %73 : vector<2x128xf32>
    %cst_40 = arith.constant 0.000000e+00 : f32
    %75 = vector.broadcast %cst_40 : f32 to vector<2x128xf32>
    %76 = arith.maximumf %74, %75 : vector<2x128xf32>
    %77 = arith.truncf %76 : vector<2x128xf32> to vector<2x128xbf16>
    %c0_41 = arith.constant 0 : index
    %c0_42 = arith.constant 0 : index
    %78 = vector.load %arg8[%c0_41, %c0_42] : memref<128x128xbf16, #tpu.memory_space<vmem>>, vector<128x128xbf16>
    %cst_43 = arith.constant dense<0.000000e+00> : vector<2x128xf32>
    %79 = tpu.matmul %77, %78, %cst_43 {dimension_numbers = #tpu.dot_dimension_numbers<[1], [0], [0], [1], [0, 0, 1, 1], [], []>} : vector<2x128xbf16>, vector<128x128xbf16>, vector<2x128xf32> -> vector<2x128xf32>
    %c0_44 = arith.constant 0 : index
    %c0_45 = arith.constant 0 : index
    %80 = vector.load %arg9[%c0_44, %c0_45] : memref<1x128xf32, #tpu.memory_space<vmem>>, vector<1x128xf32>
    %81 = vector.broadcast %80 : vector<1x128xf32> to vector<2x128xf32>
    %82 = arith.addf %79, %81 : vector<2x128xf32>
    %c0_46 = arith.constant 0 : index
    %c0_47 = arith.constant 0 : index
    %83 = vector.load %arg10[%c0_46, %c0_47] : memref<2x128xf32, #tpu.memory_space<vmem>>, vector<2x128xf32>
    tpu.vector_store %arg10[%c0_46, %c0_47], %82 {strides = array<i32>} : memref<2x128xf32, #tpu.memory_space<vmem>>, vector<2x128xf32>,
    return
  }
  func.func @transform_0(%arg0: i32) -> (i32, i32) {
    %c0_i32 = arith.constant 0 : i32
    %c0_i32_0 = arith.constant 0 : i32
    return %arg0, %c0_i32 : i32, i32
  }
  func.func @transform_1(%arg0: i32) -> (i32, i32) {
    %c0_i32 = arith.constant 0 : i32
    %c0_i32_0 = arith.constant 0 : i32
    %c0_i32_1 = arith.constant 0 : i32
    return %c0_i32, %c0_i32_0 : i32, i32
  }
  func.func @transform_2(%arg0: i32) -> (i32, i32) {
    %c0_i32 = arith.constant 0 : i32
    %c0_i32_0 = arith.constant 0 : i32
    %c0_i32_1 = arith.constant 0 : i32
    return %c0_i32, %c0_i32_0 : i32, i32
  }
  func.func @transform_3(%arg0: i32) -> (i32, i32, i32) {
    %c0_i32 = arith.constant 0 : i32
    %c0_i32_0 = arith.constant 0 : i32
    %c0_i32_1 = arith.constant 0 : i32
    %c0_i32_2 = arith.constant 0 : i32
    return %c0_i32, %c0_i32_0, %c0_i32_1 : i32, i32, i32
  }
  func.func @transform_4(%arg0: i32) -> (i32, i32) {
    %c0_i32 = arith.constant 0 : i32
    %c0_i32_0 = arith.constant 0 : i32
    %c0_i32_1 = arith.constant 0 : i32
    return %c0_i32, %c0_i32_0 : i32, i32
  }
  func.func @transform_5(%arg0: i32) -> (i32, i32, i32) {
    %c0_i32 = arith.constant 0 : i32
    %c0_i32_0 = arith.constant 0 : i32
    %c0_i32_1 = arith.constant 0 : i32
    %c0_i32_2 = arith.constant 0 : i32
    return %c0_i32, %c0_i32_0, %c0_i32_1 : i32, i32, i32
  }
  func.func @transform_6(%arg0: i32) -> (i32, i32) {
    %c0_i32 = arith.constant 0 : i32
    %c0_i32_0 = arith.constant 0 : i32
    %c0_i32_1 = arith.constant 0 : i32
    return %c0_i32, %c0_i32_0 : i32, i32
  }
  func.func @transform_7(%arg0: i32) -> (i32, i32) {
    %c0_i32 = arith.constant 0 : i32
    %c0_i32_0 = arith.constant 0 : i32
    %c0_i32_1 = arith.constant 0 : i32
    return %c0_i32, %c0_i32_0 : i32, i32
  }
  func.func @transform_8(%arg0: i32) -> (i32, i32) {
    %c0_i32 = arith.constant 0 : i32
    %c0_i32_0 = arith.constant 0 : i32
    %c0_i32_1 = arith.constant 0 : i32
    return %c0_i32, %c0_i32_0 : i32, i32
  }
  func.func @transform_9(%arg0: i32) -> (i32, i32) {
    %c0_i32 = arith.constant 0 : i32
    %c0_i32_0 = arith.constant 0 : i32
    return %arg0, %c0_i32 : i32, i32
  }
}

</mosaic_0001>

<bundles_post_ra>
// kernel: _forward_impl.1
= control target key start
LH: loop header
LB: loop body
LE: loop exit
PB: predicated region body
PF: predicated region fallthrough
CT: control target
= control target key end

     0   :  { %vm282_vm0 = vcmask 130048   ;;  %s4221_s0 = inlined_call_operand.vmem [shape: bf16[28,272], index: 0, kind: input, shape index: {}]   ;;  %s4222_s1 = inlined_call_operand.vmem [shape: bf16[272,224], index: 1, kind: input, shape index: {}]   ;;  %s4223_s2 = inlined_call_operand.vmem [shape: f32[1,224], index: 2, kind: input, shape index: {}]   ;;  %s4224_s3 = inlined_call_operand.vmem [shape: bf16[4,208,160], index: 3, kind: input, shape index: {}]   ;;  %s4225_s4 = inlined_call_operand.vmem [shape: f32[1,160], index: 4, kind: input, shape index: {}]   ;;  %s4226_s5 = inlined_call_operand.vmem [shape: bf16[4,128,128], index: 5, kind: input, shape index: {}]   ;;  %s4227_s6 = inlined_call_operand.vmem [shape: f32[1,128], index: 6, kind: input, shape index: {}]   ;;  %s4228_s7 = inlined_call_operand.vmem [shape: bf16[128,128], index: 7, kind: input, shape index: {}]   ;;  %s4229_s8 = inlined_call_operand.vmem [shape: f32[1,128], index: 8, kind: input, shape index: {}]   ;;  %s4230_s9 = inlined_call_operand.hbm [shape: f32[2,128], index: 9, kind: output, shape index: {}]  }
   0x1   :  { %v1968_v0 = vld [vmem:[%s4222_s1 + $0x70] sm:$0xf]  ;;  %v2781_v1 = vld [vmem:[%s4222_s1 + $0x74] sm:$0xf0]  ;;  %v1960_v5 = vld [vmem:[%s4222_s1 + $0x60] sm:$0xf] }
   0x2   :  { %v2032_v2 = vld [vmem:[%s4222_s1 + $0xf0] sm:$0xf]  ;;  %v1969_v3 = vor.u32 %v2781_v1, %v1968_v0  ;;  %v2797_v4 = vld [vmem:[%s4222_s1 + $0xf4] sm:$0xf0]  ;;  %v2779_v6 = vld [vmem:[%s4222_s1 + $0x64] sm:$0xf0] }
   0x3   :  { %v2033_v7 = vor.u32 %v2797_v4, %v2032_v2  ;;  %v2024_v8 = vld [vmem:[%s4222_s1 + $0xe0] sm:$0xf]  ;;  %v2795_v9 = vld [vmem:[%s4222_s1 + $0xe4] sm:$0xf0]  ;;  %v1961_v10 = vor.u32 %v2779_v6, %v1960_v5  ;;  %v1952_v12 = vld [vmem:[%s4222_s1 + $0x50] sm:$0xf] }
   0x4   :  { %289 = vmatpush.bf16.msra.mxu0 %v1969_v3  ;;  %v2025_v11 = vor.u32 %v2795_v9, %v2024_v8  ;;  %v2777_v13 = vld [vmem:[%s4222_s1 + $0x54] sm:$0xf0]  ;;  %v2040_v14 = vld [vmem:[%s4222_s1 + $0x100] sm:$0xf]  ;;  %v2016_v15 = vld [vmem:[%s4222_s1 + $0xd0] sm:$0xf] }
   0x5   :  { %308 = vmatpush.bf16.msra.mxu1 %v2033_v7  ;;  %v2793_v16 = vld [vmem:[%s4222_s1 + $0xd4] sm:$0xf0]  ;;  %v2799_v17 = vld [vmem:[%s4222_s1 + $0x104] sm:$0xf0]  ;;  %v2780_v19 = vld [vmem:[%s4222_s1 + $0x74] sm:$0xf]  ;;  %v1953_v22 = vor.u32 %v2777_v13, %v1952_v12 }
   0x6   :  { %v2041_v18 = vor.u32 %v2799_v17, %v2040_v14  ;;  %v1970_v20 = vld [vmem:[%s4222_s1 + $0x78] sm:$0xf0]  ;;  %v1896_v21 = vld [vmem:[%s4221_s0 + $0x8] sm:$0xf]  ;;  %v1944_v23 = vld [vmem:[%s4222_s1 + $0x40] sm:$0xf]  ;;  %v2017_v27 = vor.u32 %v2793_v16, %v2016_v15 }
   0x7   :  { %v2775_v24 = vld [vmem:[%s4222_s1 + $0x44] sm:$0xf0]  ;;  %v1973_v25 = vor.u32 %v2780_v19, %v1970_v20  ;;  %v2762_v26 = vld [vmem:[%s4221_s0 + $0x10] sm:$0xf0]  ;;  %v2034_v30 = vld [vmem:[%s4222_s1 + $0xf8] sm:$0xf0] }
   0x8   :  { %290 = vmatpush.bf16.msra.mxu0 %v1961_v10  ;;  %334 = vmatpush.bf16.msra.mxu2 %v2041_v18  ;;  %v3118_v28 = vor.u32 %v2762_v26, %v1896_v21  ;;  %v2796_v29 = vld [vmem:[%s4222_s1 + $0xf4] sm:$0xf]  ;;  %v2008_v31 = vld [vmem:[%s4222_s1 + $0xc0] sm:$0xf]  ;;  %v2791_v32 = vld [vmem:[%s4222_s1 + $0xc4] sm:$0xf0]  ;;  %v1945_v36 = vor.u32 %v2775_v24, %v1944_v23 }
   0x9   :  { %309 = vmatpush.bf16.msra.mxu1 %v2025_v11  ;;  %346 = vmatpush.bf16.msra.mxu3 %v1973_v25  ;;  %v2037_v33 = vor.u32 %v2796_v29, %v2034_v30  ;;  %v2778_v34 = vld [vmem:[%s4222_s1 + $0x64] sm:$0xf]  ;;  %v1962_v35 = vld [vmem:[%s4222_s1 + $0x68] sm:$0xf0]  ;;  %v1936_v37 = vld [vmem:[%s4222_s1 + $0x30] sm:$0xf]  ;;  %v2009_v41 = vor.u32 %v2791_v32, %v2008_v31 }
   0xa   :  { %v1965_v38 = vor.u32 %v2778_v34, %v1962_v35  ;;  %v2794_v39 = vld [vmem:[%s4222_s1 + $0xe4] sm:$0xf]  ;;  %v2026_v40 = vld [vmem:[%s4222_s1 + $0xe8] sm:$0xf0]  ;;  %v2773_v42 = vld [vmem:[%s4222_s1 + $0x34] sm:$0xf0] }
   0xb   :  { %2046 = vmatmul.msk.bf16.vlgmr.msra.gmra.mxu2 %vm282_vm0, %v3118_v28  ;;  %v2029_v43 = vor.u32 %v2794_v39, %v2026_v40  ;;  %v2776_v44 = vld [vmem:[%s4222_s1 + $0x54] sm:$0xf]  ;;  %v1954_v45 = vld [vmem:[%s4222_s1 + $0x58] sm:$0xf0]  ;;  %v2000_v46 = vld [vmem:[%s4222_s1 + $0xb0] sm:$0xf]  ;;  %v1937_v51 = vor.u32 %v2773_v42, %v1936_v37 }
   0xc   :  { %291 = vmatpush.bf16.msra.mxu0 %v1953_v22  ;;  %365 = vmatpush.bf16.msrb.mxu2 %v2037_v33  ;;  %v2789_v47 = vld [vmem:[%s4222_s1 + $0xb4] sm:$0xf0]  ;;  %v1957_v48 = vor.u32 %v2776_v44, %v1954_v45  ;;  %v2792_v49 = vld [vmem:[%s4222_s1 + $0xd4] sm:$0xf]  ;;  %v2018_v50 = vld [vmem:[%s4222_s1 + $0xd8] sm:$0xf0] }
   0xd   :  { %310 = vmatpush.bf16.msra.mxu1 %v2017_v27  ;;  %347 = vmatpush.bf16.msra.mxu3 %v1965_v38  ;;  %v2774_v52 = vld [vmem:[%s4222_s1 + $0x44] sm:$0xf]  ;;  %v1946_v53 = vld [vmem:[%s4222_s1 + $0x48] sm:$0xf0]  ;;  %v2001_v54 = vor.u32 %v2789_v47, %v2000_v46  ;;  %v1928_v55 = vld [vmem:[%s4222_s1 + $0x20] sm:$0xf]  ;;  %v2021_v58 = vor.u32 %v2792_v49, %v2018_v50 }
   0xe   :  { %v2771_v56 = vld [vmem:[%s4222_s1 + $0x24] sm:$0xf0]  ;;  %v1992_v57 = vld [vmem:[%s4222_s1 + $0xa0] sm:$0xf]  ;;  %v1949_v60 = vor.u32 %v2774_v52, %v1946_v53  ;;  %v2790_v61 = vld [vmem:[%s4222_s1 + $0xc4] sm:$0xf] }
   0xf   :  { %v2787_v59 = vld [vmem:[%s4222_s1 + $0xa4] sm:$0xf0]  ;;  %v2010_v62 = vld [vmem:[%s4222_s1 + $0xc8] sm:$0xf0]  ;;  %v2772_v63 = vld [vmem:[%s4222_s1 + $0x34] sm:$0xf]  ;;  %v1929_v1 = vor.u32 %v2771_v56, %v1928_v55 }
  0x10   :  { %292 = vmatpush.bf16.msra.mxu0 %v1945_v36  ;;  %366 = vmatpush.bf16.msrb.mxu2 %v2029_v43  ;;  %v1938_v0 = vld [vmem:[%s4222_s1 + $0x38] sm:$0xf0]  ;;  %v1920_v2 = vld [vmem:[%s4222_s1 + $0x10] sm:$0xf]  ;;  %v2769_v3 = vld [vmem:[%s4222_s1 + $0x14] sm:$0xf0]  ;;  %v1993_v4 = vor.u32 %v2787_v59, %v1992_v57  ;;  %v2013_v6 = vor.u32 %v2790_v61, %v2010_v62 }
  0x11   :  { %311 = vmatpush.bf16.msra.mxu1 %v2009_v41  ;;  %348 = vmatpush.bf16.msra.mxu3 %v1957_v48  ;;  %v1984_v5 = vld [vmem:[%s4222_s1 + $0x90] sm:$0xf]  ;;  %v1908_v7 = vld [vmem:[%s4221_s0 + $0x20] sm:$0xf]  ;;  %v2765_v8 = vld [vmem:[%s4221_s0 + $0x28] sm:$0x30]  ;;  %v1941_v10 = vor.u32 %v2772_v63, %v1938_v0  ;;  %v1921_v15 = vor.u32 %v2769_v3, %v1920_v2 }
  0x12   :  { %v2785_v9 = vld [vmem:[%s4222_s1 + $0x94] sm:$0xf0]  ;;  %v2788_v11 = vld [vmem:[%s4222_s1 + $0xb4] sm:$0xf]  ;;  %v2002_v12 = vld [vmem:[%s4222_s1 + $0xb8] sm:$0xf0]  ;;  %v3233_v17 = vor.u32 %v2765_v8, %v1908_v7 }
  0x13   :  { %v2770_v13 = vld [vmem:[%s4222_s1 + $0x24] sm:$0xf]  ;;  %v1930_v14 = vld [vmem:[%s4222_s1 + $0x28] sm:$0xf0]  ;;  %v1912_v16 = vld [vmem:[%s4222_s1] sm:$0xf]  ;;  %v1985_v18 = vor.u32 %v2785_v9, %v1984_v5  ;;  %v2005_v22 = vor.u32 %v2788_v11, %v2002_v12 }
  0x14   :  { %293 = vmatpush.bf16.msra.mxu0 %v1937_v51  ;;  %367 = vmatpush.bf16.msrb.mxu2 %v2021_v58  ;;  %v2767_v19 = vld [vmem:[%s4222_s1 + $0x4] sm:$0xf0]  ;;  %v1976_v20 = vld [vmem:[%s4222_s1 + $0x80] sm:$0xf]  ;;  %v2761_v24 = vld [vmem:[%s4221_s0 + $0x8] sm:$0xf0]  ;;  %v1933_v27 = vor.u32 %v2770_v13, %v1930_v14 }
  0x15   :  { %312 = vmatpush.bf16.msra.mxu1 %v2001_v54  ;;  %349 = vmatpush.bf16.msra.mxu3 %v1949_v60  ;;  %v2783_v21 = vld [vmem:[%s4222_s1 + $0x84] sm:$0xf0]  ;;  %v1888_v23 = vld [vmem:[%s4221_s0] sm:$0xf]  ;;  %v2798_v25 = vld [vmem:[%s4222_s1 + $0x104] sm:$0xf]  ;;  %v1913_v33 = vor.u32 %v2767_v19, %v1912_v16 }
  0x16   :  { %v2042_v26 = vld [vmem:[%s4222_s1 + $0x108] sm:$0xf0]  ;;  %v2786_v29 = vld [vmem:[%s4222_s1 + $0xa4] sm:$0xf]  ;;  %v2768_v31 = vld [vmem:[%s4222_s1 + $0x14] sm:$0xf] }
  0x17   :  { %v1994_v30 = vld [vmem:[%s4222_s1 + $0xa8] sm:$0xf0]  ;;  %v1922_v32 = vld [vmem:[%s4222_s1 + $0x18] sm:$0xf0] }
  0x18   :  { %294 = vmatpush.bf16.msra.mxu0 %v1929_v1  ;;  %368 = vmatpush.bf16.msrb.mxu2 %v2013_v6 }
  0x19   :  { %313 = vmatpush.bf16.msra.mxu1 %v1993_v4  ;;  %350 = vmatpush.bf16.msra.mxu3 %v1941_v10 }
  0x1b   :  { %2047 = vmatmul.msk.bf16.gmra.mxu2 %vm282_vm0, %v3233_v17 }
  0x1c   :  { %295 = vmatpush.bf16.msra.mxu0 %v1921_v15 }
  0x1d   :  { %14 = vsyncpa [#allocation3], 0  ;;  %314 = vmatpush.bf16.msra.mxu1 %v1985_v18  ;;  %v1977_v34 = vor.u32 %v2783_v21, %v1976_v20  ;;  %369 = vmatpush.bf16.msrb.mxu2 %v2005_v22  ;;  %v2045_v35 = vor.u32 %v2798_v25, %v2042_v26  ;;  %v2760_v36 = vld [vmem:[%s4221_s0 + $0x4] sm:$0xf]  ;;  %v1890_v37 = vld [vmem:[%s4221_s0 + $0xc] sm:$0xf0]  ;;  %v1997_v38 = vor.u32 %v2786_v29, %v1994_v30 }
  0x1e   :  { %351 = vmatpush.bf16.msra.mxu3 %v1933_v27  ;;  %v1925_v39 = vor.u32 %v2768_v31, %v1922_v32  ;;  %v2784_v40 = vld [vmem:[%s4222_s1 + $0x94] sm:$0xf]  ;;  %v1889_v41 = vor.u32 %v2761_v24, %v1888_v23  ;;  %v1986_v42 = vld [vmem:[%s4222_s1 + $0x98] sm:$0xf0]  ;;  %v2766_v43 = vld [vmem:[%s4222_s1 + $0x4] sm:$0xf]  ;;  %v1893_v45 = vor.u32 %v2760_v36, %v1890_v37 }
  0x1f   :  { %v1914_v44 = vld [vmem:[%s4222_s1 + $0x8] sm:$0xf0]  ;;  %v1989_v46 = vor.u32 %v2784_v40, %v1986_v42  ;;  %v2782_v48 = vld [vmem:[%s4222_s1 + $0x84] sm:$0xf]  ;;  %v1900_v51 = vld [vmem:[%s4221_s0 + $0x18] sm:$0xf] }
  0x20   :  { %296 = vmatpush.bf16.msra.mxu0 %v1913_v33  ;;  %v1917_v47 = vor.u32 %v2766_v43, %v1914_v44  ;;  %v1978_v49 = vld [vmem:[%s4222_s1 + $0x88] sm:$0xf0]  ;;  %v2764_v52 = vld [vmem:[%s4221_s0 + $0x20] sm:$0x30]  ;;  %v2763_v53 = vld [vmem:[%s4221_s0 + $0x1c] sm:$0xf] }
  0x21   :  { %315 = vmatpush.bf16.msra.mxu1 %v1977_v34  ;;  %370 = vmatpush.bf16.msrb.mxu2 %v1997_v38  ;;  %v1981_v50 = vor.u32 %v2782_v48, %v1978_v49  ;;  %v1902_v54 = vld [vmem:[%s4221_s0 + $0x24] sm:$0x30]  ;;  %v1901_v55 = vor.u32 %v2764_v52, %v1900_v51  ;;  %v76_v1 = vld [vmem:[%s4223_s2] sm:$0x3]  ;;  %v2840_v23 = vld [vmem:[%s4224_s3 + $0x144] sm:$0xf] }
  0x22   :  { %352 = vmatpush.bf16.msra.mxu3 %v1925_v39  ;;  %v1905_v56 = vor.u32 %v2763_v53, %v1902_v54  ;;  %v78_v4 = vperm.slane %v76_v1, 0  ;;  %v3315_v5 = vperm.slane %v76_v1, 1  ;;  %v2136_v24 = vld [vmem:[%s4224_s3 + $0x148] sm:$0xf0]  ;;  %v2838_v25 = vld [vmem:[%s4224_s3 + $0x134] sm:$0xf] }
  0x23   :  { %297 = vmatmul.bf16.vlgmr.msra.gmra.mxu0 %v1889_v41  ;;  %v2139_v29 = vor.u32 %v2840_v23, %v2136_v24  ;;  %v2128_v30 = vld [vmem:[%s4224_s3 + $0x138] sm:$0xf0]  ;;  %v2134_v33 = vld [vmem:[%s4224_s3 + $0x140] sm:$0xf]  ;;  %v2841_v34 = vld [vmem:[%s4224_s3 + $0x144] sm:$0xf0] }
  0x24   :  { %391 = vmatpush.bf16.msrb.mxu0 %v2045_v35  ;;  %316 = vmatmul.bf16.vlgmr.msra.gmra.mxu1 %v1893_v45  ;;  %v2131_v37 = vor.u32 %v2838_v25, %v2128_v30  ;;  %v2135_v38 = vor.u32 %v2841_v34, %v2134_v33  ;;  %v2126_v39 = vld [vmem:[%s4224_s3 + $0x130] sm:$0xf]  ;;  %v2836_v43 = vld [vmem:[%s4224_s3 + $0x124] sm:$0xf]  ;;  %v2120_v44 = vld [vmem:[%s4224_s3 + $0x128] sm:$0xf0] }
  0x25   :  { %371 = vmatpush.bf16.msrb.mxu2 %v1989_v46  ;;  %v2118_v51 = vld [vmem:[%s4224_s3 + $0x120] sm:$0xf]  ;;  %v2837_v53 = vld [vmem:[%s4224_s3 + $0x124] sm:$0xf0]  ;;  %v2240_v54 = vld [vmem:[%s4224_s3 + $0x70] sm:$0xf] }
  0x26   :  { %353 = vmatpush.bf16.msra.mxu3 %v1917_v47  ;;  %716 = vmatpush.bf16.msrb.mxu1 %v2135_v38  ;;  %v2112_v1 = vld [vmem:[%s4224_s3 + $0x118] sm:$0xf0]  ;;  %vm438_vm1 = vcmask 1043456   ;;  %v2832_v24 = vld [vmem:[%s4224_s3 + $0x104] sm:$0xf]  ;;  %s3005_s25 = smov 112  }
  0x27   :  { %v2104_v25 = vld [vmem:[%s4224_s3 + $0x108] sm:$0xf0]  ;;  %vm417_vm2 = vcmask 1041408   ;;  %v2102_v33 = vld [vmem:[%s4224_s3 + $0x100] sm:$0xf]  ;;  %vm469_vm3 = vcmask 916480  }
  0x28   :  { %v2833_v34 = vld [vmem:[%s4224_s3 + $0x104] sm:$0xf0]  ;;  %vm712_vm4 = vcmask 654336   ;;  %vm1437_vm5 = vcmask 1045504   ;;  %s3006_s23 = smov 96   ;;  %vm1454_vm6 = vcmask 785408  }
  0x29   :  { %354 = vmatmul.bf16.vlgmr.msra.gmra.mxu3 %v1889_v41  ;;  %372 = vmatpush.bf16.msrb.mxu2 %v1981_v50  ;;  %s3007_s15 = smov [#allocation2]   ;;  %s1877_s19 = sshll.u32 %s4230_s9, 4  ;;  %s1878_s19 = int_to_ptr.hbm [resolvable:$true] %s1877_s19 }
  0x2a   :  { %s1875_s16 = sshll.u32 %s3007_s15, 4  ;;  %s1876_s16 = int_to_ptr.vmem [resolvable:$true] %s1875_s16 }
  0x2c   :  { %373 = vmatmul.bf16.vlgmr.msrb.gmra.mxu2 %v1893_v45  ;;  %v2839_v45 = vld [vmem:[%s4224_s3 + $0x134] sm:$0xf0] }
  0x2d   :  { %744 = vmatpush.bf16.msra.mxu2 %v2139_v29  ;;  %v2127_v50 = vor.u32 %v2839_v45, %v2126_v39  ;;  %v2107_v39 = vor.u32 %v2832_v24, %v2104_v25  ;;  %v2830_v45 = vld [vmem:[%s4224_s3 + $0xf4] sm:$0xf] }
  0x2f   :  { %717 = vmatpush.bf16.msrb.mxu1 %v2127_v50 }
  0x31   :  { %745 = vmatpush.bf16.msra.mxu2 %v2131_v37 }
  0x33   :  { %302 = vmatmul.bf16.gmra.mxu0 %v1901_v55 }
  0x34   :  { %321 = vmatmul.bf16.gmra.mxu1 %v1905_v56 }
  0x39   :  { %359 = vmatmul.bf16.gmra.mxu3 %v1901_v55  ;;  %v2815_v55 = vld [vmem:[%s4224_s3 + $0x74] sm:$0xf0] }
  0x3c   :  { %378 = vmatmul.bf16.gmra.mxu2 %v1905_v56 }
  0x43   :  { %2048 = vmatmul.msk.bf16.vlgmr.msrb.gmra.mxu0 %vm282_vm0, %v3118_v28 }
  0x53   :  { %2049 = vmatmul.msk.bf16.gmra.mxu0 %vm282_vm0, %v3233_v17 }
  0x8e   :  { %v336_v57 = vpop.f32.mrf.mxu2 }
  0x96   :  { %v338_v58 = vpop.f32.mrf.mxu2 }
  0x9e   :  { %v341_v60 = vpop.f32.mrf.mxu2 }
  0xa0   :  { %v298_v59 = vpop.f32.mrf.mxu0 }
  0xa1   :  { %v317_v62 = vpop.f32.mrf.mxu1  ;;  %v299_v7 = vadd.f32 %v298_v59, %v78_v4  ;;  %v2834_v59 = vld [vmem:[%s4224_s3 + $0x114] sm:$0xf] }
  0xa3   :  { %v318_v11 = vadd.f32 %v317_v62, %v299_v7  ;;  %v2232_v7 = vld [vmem:[%s4224_s3 + $0x60] sm:$0xf] }
  0xa5   :  { %v3318_v18 = vadd.f32 %v336_v57, %v318_v11 }
  0xa6   :  { %v3310_v63 = vpop.f32.mrf.mxu2 }
  0xa7   :  { %v403_v26 = vmax.f32 %v3318_v18, 0.0 }
  0xa8   :  { %v300_v61 = vpop.f32.mrf.mxu0 }
  0xa9   :  { %v319_v3 = vpop.f32.mrf.mxu1  ;;  %v301_v8 = vadd.f32 %v300_v61, %v78_v4  ;;  %v439_v46 = vrot.slane %v403_v26, 4 }
  0xab   :  { %v320_v13 = vadd.f32 %v319_v3, %v301_v8  ;;  %v2851_v3 = vld [vmem:[%s4224_s3 + $0x194] sm:$0xf0]  ;;  %v2110_v8 = vld [vmem:[%s4224_s3 + $0x110] sm:$0xf] }
  0xac   :  { %v355_v2 = vpop.f32.mrf.mxu3 }
  0xad   :  { %v356_v9 = vadd.f32 %v355_v2, %v3315_v5  ;;  %v339_v20 = vadd.f32 %v338_v58, %v320_v13  ;;  %v2123_v58 = vor.u32 %v2836_v43, %v2120_v44  ;;  %v2174_v2 = vld [vmem:[%s4224_s3 + $0x190] sm:$0xf]  ;;  %v2115_v13 = vor.u32 %v2834_v59, %v2112_v1 }
  0xaf   :  { %v374_v28 = vpop.f32.mrf.mxu2  ;;  %v3338_v31 = vmax.f32 %v339_v20, 0.0  ;;  %746 = vmatpush.bf16.msra.mxu2 %v2123_v58  ;;  %v2088_v58 = vld [vmem:[%s4224_s3 + $0xe8] sm:$0xf0] }
  0xb0   :  { %v303_v0 = vpop.f32.mrf.mxu0  ;;  %v375_v15 = vadd.f32 %v374_v28, %v356_v9  ;;  %v2119_v28 = vor.u32 %v2837_v53, %v2118_v51  ;;  %v2835_v9 = vld [vmem:[%s4224_s3 + $0x114] sm:$0xf0] }
  0xb1   :  { %v304_v12 = vadd.f32 %v303_v0, %v78_v4  ;;  %v322_v14 = vpop.f32.mrf.mxu1  ;;  %v3383_v0 = vmax.f32 %v3338_v31, %v439_v46  ;;  %v441_v11 = vrot.slane %v3338_v31, 4 }
  0xb2   :  { %718 = vmatpush.bf16.msrb.mxu1 %v2119_v28 }
  0xb3   :  { %v323_v19 = vadd.f32 %v322_v14, %v304_v12  ;;  %747 = vmatpush.bf16.msra.mxu2 %v2115_v13  ;;  %v2811_v13 = vld [vmem:[%s4224_s3 + $0x54] sm:$0xf0] }
  0xb4   :  { %v357_v10 = vpop.f32.mrf.mxu3 }
  0xb5   :  { %v358_v21 = vadd.f32 %v357_v10, %v3315_v5  ;;  %v3333_v27 = vadd.f32 %v341_v60, %v323_v19  ;;  %v2241_v60 = vor.u32 %v2815_v55, %v2240_v54  ;;  %v2813_v10 = vld [vmem:[%s4224_s3 + $0x64] sm:$0xf0] }
  0xb6   :  { %v2233_v14 = vor.u32 %v2813_v10, %v2232_v7 }
  0xb7   :  { %v376_v16 = vpop.f32.mrf.mxu2  ;;  %v407_v47 = vmax.f32 %v3333_v27, 0.0  ;;  %914 = vmatpush.bf16.msra.mxu0 %v2241_v60  ;;  %748 = vmatpush.bf16.msra.mxu2 %v2107_v39  ;;  %v2226_v39 = vld [vmem:[%s4224_s3 + $0x58] sm:$0xf0] }
  0xb8   :  { %v305_v6 = vpop.f32.mrf.mxu0  ;;  %v377_v35 = vadd.f32 %v376_v16, %v358_v21  ;;  %v2849_v16 = vld [vmem:[%s4224_s3 + $0x184] sm:$0xf0] }
  0xb9   :  { %v306_v40 = vadd.f32 %v305_v6, %v78_v4  ;;  %v324_v48 = vpop.f32.mrf.mxu1  ;;  %v2175_v6 = vor.u32 %v2851_v3, %v2174_v2 }
  0xbb   :  { %v325_v61 = vadd.f32 %v324_v48, %v306_v40  ;;  %733 = vmatpush.bf16.msrb.mxu3 %v2175_v6  ;;  %915 = vmatpush.bf16.msra.mxu0 %v2233_v14 }
  0xbc   :  { %v360_v32 = vpop.f32.mrf.mxu3 }
  0xbd   :  { %v361_v41 = vadd.f32 %v360_v32, %v3315_v5  ;;  %v344_v19 = vadd.f32 %v3310_v63, %v325_v61  ;;  %v2111_v63 = vor.u32 %v2835_v9, %v2110_v8  ;;  %v418_v32 = vrot.slane %v3338_v31, 6  ;;  %v2080_v61 = vld [vmem:[%s4224_s3 + $0xd8] sm:$0xf0] }
  0xbf   :  { %v379_v52 = vpop.f32.mrf.mxu2  ;;  %719 = vmatpush.bf16.msrb.mxu1 %v2111_v63 }
  0xc0   :  { %v393_v17 = vpop.f32.mrf.mxu0  ;;  %v380_v62 = vadd.f32 %v379_v52, %v361_v41  ;;  %v409_v41 = vmax.f32 %v344_v19, 0.0 }
  0xc1   :  { %v3321_v22 = vadd.f32 %v393_v17, %v375_v15  ;;  %v2166_v15 = vld [vmem:[%s4224_s3 + $0x180] sm:$0xf]  ;;  %v419_v17 = vrot.slane %v407_v47, 6 }
  0xc2   :  { %v2167_v29 = vor.u32 %v2849_v16, %v2166_v15  ;;  %v424_v59 = vrot.slane %v409_v41, 6  ;;  %v3486_v2 = vmax.f32 %v409_v41, %v441_v11  ;;  %v2094_v15 = vld [vmem:[%s4224_s3 + $0xf0] sm:$0xf]  ;;  %v2831_v16 = vld [vmem:[%s4224_s3 + $0xf4] sm:$0xf0] }
  0xc3   :  { %v404_v36 = vmax.f32 %v3321_v22, 0.0  ;;  %v420_v44 = vsel %vm417_vm2, %v418_v32, %v419_v17  ;;  %v2095_v19 = vor.u32 %v2831_v16, %v2094_v15  ;;  %v2086_v32 = vld [vmem:[%s4224_s3 + $0xe0] sm:$0xf]  ;;  %v2846_v15 = vld [vmem:[%s4224_s3 + $0x174] sm:$0xf] }
  0xc4   :  { %v362_v20 = vpop.f32.mrf.mxu3  ;;  %734 = vmatpush.bf16.msrb.mxu3 %v2167_v29  ;;  %v3460_v54 = vmax.f32 %v403_v26, %v420_v44  ;;  %v425_v3 = vsel %vm417_vm2, %v419_v17, %v424_v59  ;;  %v2158_v17 = vld [vmem:[%s4224_s3 + $0x170] sm:$0xf]  ;;  %v2216_v29 = vld [vmem:[%s4224_s3 + $0x40] sm:$0xf]  ;;  %v2807_v44 = vld [vmem:[%s4224_s3 + $0x34] sm:$0xf0] }
  0xc5   :  { %v440_v56 = vrot.slane %v404_v36, 4  ;;  %v363_v37 = vadd.f32 %v362_v20, %v3315_v5  ;;  %v2096_v5 = vld [vmem:[%s4224_s3 + $0xf8] sm:$0xf0]  ;;  %v3493_v8 = vmax.f32 %v3338_v31, %v425_v3  ;;  %v2847_v20 = vld [vmem:[%s4224_s3 + $0x174] sm:$0xf0] }
  0xc6   :  { %v2099_v52 = vor.u32 %v2830_v45, %v2096_v5  ;;  %v2242_v31 = vld [vmem:[%s4224_s3 + $0x78] sm:$0xf0]  ;;  %v2159_v24 = vor.u32 %v2847_v20, %v2158_v17  ;;  %v2078_v5 = vld [vmem:[%s4224_s3 + $0xd0] sm:$0xf]  ;;  %v2808_v59 = vld [vmem:[%s4224_s3 + $0x44] sm:$0xf] }
  0xc7   :  { %v2168_v3 = vld [vmem:[%s4224_s3 + $0x188] sm:$0xf0]  ;;  %v2160_v16 = vld [vmem:[%s4224_s3 + $0x178] sm:$0xf0]  ;;  %v2264_v17 = vld [vmem:[%s4224_s3 + $0xa0] sm:$0xf] }
  0xc8   :  { %v395_v42 = vpop.f32.mrf.mxu0  ;;  %749 = vmatpush.bf16.msra.mxu2 %v2099_v52  ;;  %735 = vmatpush.bf16.msrb.mxu3 %v2159_v24  ;;  %v2821_v20 = vld [vmem:[%s4224_s3 + $0xa4] sm:$0xf0] }
  0xc9   :  { %v396_v49 = vadd.f32 %v395_v42, %v377_v35  ;;  %v442_v35 = vsel %vm438_vm1, %v439_v46, %v441_v11  ;;  %v381_v42 = vpop.f32.mrf.mxu2  ;;  %v2814_v11 = vld [vmem:[%s4224_s3 + $0x74] sm:$0xf]  ;;  %v2265_v24 = vor.u32 %v2821_v20, %v2264_v17 }
  0xca   :  { %v3442_v40 = vmax.f32 %v407_v47, %v442_v35  ;;  %v2103_v47 = vor.u32 %v2833_v34, %v2102_v33  ;;  %v2829_v33 = vld [vmem:[%s4224_s3 + $0xe4] sm:$0xf0]  ;;  %v2150_v34 = vld [vmem:[%s4224_s3 + $0x160] sm:$0xf] }
  0xcb   :  { %v3377_v57 = vmax.f32 %v396_v49, 0.0  ;;  %v382_v49 = vadd.f32 %v381_v42, %v363_v37  ;;  %v2087_v35 = vor.u32 %v2829_v33, %v2086_v32  ;;  %v2845_v37 = vld [vmem:[%s4224_s3 + $0x164] sm:$0xf0] }
  0xcc   :  { %720 = vmatpush.bf16.msrb.mxu1 %v2103_v47  ;;  %v2151_v41 = vor.u32 %v2845_v37, %v2150_v34  ;;  %v2877_v33 = vld [vmem:[%s4224_s3 + $0x264] sm:$0xf0]  ;;  %v2152_v37 = vld [vmem:[%s4224_s3 + $0x168] sm:$0xf0] }
  0xcd   :  { %v3395_v4 = vmax.f32 %v3377_v57, %v440_v56  ;;  %v443_v23 = vrot.slane %v3377_v57, 4  ;;  %v421_v27 = vrot.slane %v3377_v57, 6 }
  0xce   :  { %736 = vmatpush.bf16.msrb.mxu3 %v2151_v41  ;;  %v2819_v41 = vld [vmem:[%s4224_s3 + $0x94] sm:$0xf0] }
  0xcf   :  { %v2947_v12 = vpack.i.bf16 %v3395_v4, %v3383_v0  ;;  %v444_v43 = vsel %vm438_vm1, %v440_v56, %v443_v23  ;;  %v2828_v56 = vld [vmem:[%s4224_s3 + $0xe4] sm:$0xf] }
  0xd0   :  { %v398_v21 = vpop.f32.mrf.mxu0  ;;  %v2091_v22 = vor.u32 %v2828_v56, %v2088_v58  ;;  %721 = vmatpush.bf16.msrb.mxu1 %v2095_v19  ;;  %v2280_v56 = vld [vmem:[%s4224_s3 + $0xc0] sm:$0xf]  ;;  %v2825_v58 = vld [vmem:[%s4224_s3 + $0xc4] sm:$0xf0]  ;;  %v2163_v19 = vor.u32 %v2846_v15, %v2160_v16 }
  0xd1   :  { %v399_v30 = vadd.f32 %v398_v21, %v380_v62  ;;  %2948 = vrot.lane.b32.xlu0 %v2947_v12, %s3005_s25  ;;  %v2245_v12 = vor.u32 %v2814_v11, %v2242_v31  ;;  %v2812_v21 = vld [vmem:[%s4224_s3 + $0x64] sm:$0xf]  ;;  %v2210_v11 = vld [vmem:[%s4224_s3 + $0x38] sm:$0xf0] }
  0xd2   :  { %750 = vmatpush.bf16.msra.mxu2 %v2091_v22  ;;  %v2805_v22 = vld [vmem:[%s4224_s3 + $0x24] sm:$0xf0] }
  0xd3   :  { %v408_v38 = vmax.f32 %v399_v30, 0.0  ;;  %v2809_v30 = vld [vmem:[%s4224_s3 + $0x44] sm:$0xf0] }
  0xd4   :  { %v2217_v63 = vor.u32 %v2809_v30, %v2216_v29  ;;  %722 = vmatpush.bf16.msrb.mxu1 %v2087_v35  ;;  %v2184_v29 = vld [vmem:[%s4224_s3] sm:$0xf]  ;;  %v2801_v30 = vld [vmem:[%s4224_s3 + $0x4] sm:$0xf0]  ;;  %v2844_v35 = vld [vmem:[%s4224_s3 + $0x164] sm:$0xf] }
  0xd5   :  { %v422_v46 = vrot.slane %v408_v38, 6  ;;  %v3452_v48 = vmax.f32 %v408_v38, %v444_v43  ;;  %v2810_v38 = vld [vmem:[%s4224_s3 + $0x54] sm:$0xf]  ;;  %v2208_v43 = vld [vmem:[%s4224_s3 + $0x30] sm:$0xf]  ;;  %v2185_v32 = vor.u32 %v2801_v30, %v2184_v29 }
  0xd6   :  { %v2229_v42 = vor.u32 %v2810_v38, %v2226_v39  ;;  %v2209_v45 = vor.u32 %v2807_v44, %v2208_v43  ;;  %v2256_v38 = vld [vmem:[%s4224_s3 + $0x90] sm:$0xf]  ;;  %v2155_v39 = vor.u32 %v2844_v35, %v2152_v37  ;;  %v2194_v43 = vld [vmem:[%s4224_s3 + $0x18] sm:$0xf0] }
  0xd7   :  { %v2952_v50 = vpack.i.bf16 %v3452_v48, %v3442_v40  ;;  %v423_v51 = vsel %vm417_vm2, %v421_v27, %v422_v46  ;;  %v2142_v27 = vld [vmem:[%s4224_s3 + $0x150] sm:$0xf]  ;;  %v2257_v44 = vor.u32 %v2819_v41, %v2256_v38 }
  0xd8   :  { %v400_v53 = vpop.f32.mrf.mxu0  ;;  %v3464_v55 = vmax.f32 %v404_v36, %v423_v51  ;;  %v2826_v36 = vld [vmem:[%s4224_s3 + $0xd4] sm:$0xf]  ;;  %v2176_v51 = vld [vmem:[%s4224_s3 + $0x198] sm:$0xf0] }
  0xd9   :  { %v401_v60 = vadd.f32 %v400_v53, %v382_v49  ;;  %2953 = vrot.lane.b32.xlu0 %v2952_v50, %s3005_s25  ;;  %v2083_v7 = vor.u32 %v2826_v36, %v2080_v61  ;;  %v2843_v49 = vld [vmem:[%s4224_s3 + $0x154] sm:$0xf0]  ;;  %v2850_v50 = vld [vmem:[%s4224_s3 + $0x194] sm:$0xf] }
  0xda   :  { %v2957_v18 = vpack.i.bf16 %v3464_v55, %v3460_v54  ;;  %v2143_v52 = vor.u32 %v2843_v49, %v2142_v27  ;;  %v2179_v53 = vor.u32 %v2850_v50, %v2176_v51  ;;  %v2144_v49 = vld [vmem:[%s4224_s3 + $0x158] sm:$0xf0]  ;;  %v2248_v50 = vld [vmem:[%s4224_s3 + $0x80] sm:$0xf] }
  0xdb   :  { %v410_v26 = vmax.f32 %v401_v60, 0.0  ;;  %751 = vmatpush.bf16.msra.mxu2 %v2083_v7  ;;  %v2281_v60 = vor.u32 %v2825_v58, %v2280_v56  ;;  %v2823_v7 = vld [vmem:[%s4224_s3 + $0xb4] sm:$0xf0]  ;;  %v2186_v56 = vld [vmem:[%s4224_s3 + $0x8] sm:$0xf0] }
  0xdc   :  { %2958 = vrot.lane.b32.xlu1 %v2957_v18, %s3005_s25  ;;  %v2218_v18 = vld [vmem:[%s4224_s3 + $0x48] sm:$0xf0]  ;;  %737 = vmatpush.bf16.msrb.mxu3 %v2143_v52  ;;  %v2817_v52 = vld [vmem:[%s4224_s3 + $0x84] sm:$0xf0] }
  0xdd   :  { %v426_v62 = vrot.slane %v410_v26, 6  ;;  %v3482_v1 = vmax.f32 %v410_v26, %v443_v23  ;;  %v2234_v23 = vld [vmem:[%s4224_s3 + $0x68] sm:$0xf0]  ;;  %v2200_v26 = vld [vmem:[%s4224_s3 + $0x20] sm:$0xf]  ;;  %v2221_v36 = vor.u32 %v2808_v59, %v2218_v18  ;;  %v2249_v58 = vor.u32 %v2817_v52, %v2248_v50 }
  0xde   :  { %v2237_v25 = vor.u32 %v2812_v21, %v2234_v23  ;;  %v2201_v61 = vor.u32 %v2805_v22, %v2200_v26  ;;  %v2804_v21 = vld [vmem:[%s4224_s3 + $0x24] sm:$0xf]  ;;  %v2202_v23 = vld [vmem:[%s4224_s3 + $0x28] sm:$0xf0]  ;;  %v2873_v18 = vld [vmem:[%s4224_s3 + $0x244] sm:$0xf0] }
  0xdf   :  { %v2967_v28 = vpack.i.bf16 %v3482_v1, %v3486_v2  ;;  %v427_v6 = vsel %vm417_vm2, %v422_v46, %v426_v62  ;;  %942 = vmatpush.bf16.msrb.mxu2 %v2245_v12  ;;  %v2827_v46 = vld [vmem:[%s4224_s3 + $0xd4] sm:$0xf0]  ;;  %v2848_v62 = vld [vmem:[%s4224_s3 + $0x184] sm:$0xf]  ;;  %v2388_v22 = vld [vmem:[%s4224_s3 + $0x230] sm:$0xf] }
  0xe0   :  { %v3496_v9 = vmax.f32 %v3377_v57, %v427_v6  ;;  %v2224_v57 = vld [vmem:[%s4224_s3 + $0x50] sm:$0xf]  ;;  %v2079_v47 = vor.u32 %v2827_v46, %v2078_v5  ;;  %931 = vmatpush.bf16.msra.mxu3 %v2281_v60  ;;  %v2171_v6 = vor.u32 %v2848_v62, %v2168_v3  ;;  %v2875_v46 = vld [vmem:[%s4224_s3 + $0x254] sm:$0xf0]  ;;  %v2396_v60 = vld [vmem:[%s4224_s3 + $0x240] sm:$0xf] }
  0xe1   :  { %2968 = vrot.lane.b32.xlu2 %v2967_v28, %s3005_s25  ;;  %v2225_v14 = vor.u32 %v2811_v13, %v2224_v57  ;;  %v2272_v28 = vld [vmem:[%s4224_s3 + $0xb0] sm:$0xf]  ;;  %v2803_v13 = vld [vmem:[%s4224_s3 + $0x14] sm:$0xf0]  ;;  %v2397_v26 = vor.u32 %v2873_v18, %v2396_v60  ;;  %v2380_v62 = vld [vmem:[%s4224_s3 + $0x220] sm:$0xf] }
  0xe2   :  { %v2962_v10 = vpack.i.bf16 %v3496_v9, %v3493_v8  ;;  %723 = vmatpush.bf16.msrb.mxu1 %v2079_v47  ;;  %v2273_v31 = vor.u32 %v2823_v7, %v2272_v28  ;;  %v2192_v57 = vld [vmem:[%s4224_s3 + $0x10] sm:$0xf]  ;;  %v2842_v47 = vld [vmem:[%s4224_s3 + $0x154] sm:$0xf]  ;;  %v2869_v3 = vld [vmem:[%s4224_s3 + $0x224] sm:$0xf0] }
  0xe3   :  { %916 = vmatpush.bf16.msra.mxu0 %v2225_v14  ;;  %943 = vmatpush.bf16.msrb.mxu2 %v2237_v25  ;;  %v2193_v14 = vor.u32 %v2803_v13, %v2192_v57  ;;  %v2205_v25 = vor.u32 %v2804_v21, %v2202_v23  ;;  %v2404_v5 = vld [vmem:[%s4224_s3 + $0x250] sm:$0xf]  ;;  %v2147_v51 = vor.u32 %v2842_v47, %v2144_v49  ;;  %v2274_v49 = vld [vmem:[%s4224_s3 + $0xb8] sm:$0xf0]  ;;  %v2864_v50 = vld [vmem:[%s4224_s3 + $0x204] sm:$0xf] }
  0xe4   :  { %2963 = vrot.lane.b32.xlu1 %v2962_v10, %s3005_s25  ;;  %v2806_v10 = vld [vmem:[%s4224_s3 + $0x34] sm:$0xf]  ;;  %932 = vmatpush.bf16.msra.mxu3 %v2273_v31  ;;  %v2405_v27 = vor.u32 %v2875_v46, %v2404_v5 }
  0xe5   :  { %v2213_v12 = vor.u32 %v2806_v10, %v2210_v11 }
  0xe6   :  { %761 = vmatpush.bf16.msra.mxu1 %v2179_v53  ;;  %v2800_v53 = vld [vmem:[%s4224_s3 + $0x4] sm:$0xf] }
  0xe7   :  { %917 = vmatpush.bf16.msra.mxu0 %v2217_v63  ;;  %944 = vmatpush.bf16.msrb.mxu2 %v2229_v42  ;;  %v2412_v63 = vld [vmem:[%s4224_s3 + $0x260] sm:$0xf]  ;;  %v2802_v42 = vld [vmem:[%s4224_s3 + $0x14] sm:$0xf]  ;;  %v2189_v59 = vor.u32 %v2800_v53, %v2186_v56 }
  0xe8   :  { %933 = vmatpush.bf16.msra.mxu3 %v2265_v24  ;;  %v2413_v34 = vor.u32 %v2877_v33, %v2412_v63  ;;  %v2866_v33 = vld [vmem:[%s4224_s3 + $0x214] sm:$0xf] }
  0xea   :  { %762 = vmatpush.bf16.msra.mxu1 %v2171_v6  ;;  %v2381_v6 = vor.u32 %v2869_v3, %v2380_v62  ;;  %v2358_v62 = vld [vmem:[%s4224_s3 + $0x1f8] sm:$0xf0]  ;;  %v2504_v3 = vld [vmem:[%s4224_s3 + $0x2e0] sm:$0xf] }
  0xeb   :  { %918 = vmatpush.bf16.msra.mxu0 %v2209_v45  ;;  %945 = vmatpush.bf16.msrb.mxu2 %v2221_v36  ;;  %v2197_v45 = vor.u32 %v2802_v42, %v2194_v43  ;;  %v2871_v36 = vld [vmem:[%s4224_s3 + $0x234] sm:$0xf0] }
  0xec   :  { %934 = vmatpush.bf16.msra.mxu3 %v2257_v44 }
  0xee   :  { %763 = vmatpush.bf16.msra.mxu1 %v2163_v19 }
  0xef   :  { %919 = vmatpush.bf16.msra.mxu0 %v2201_v61  ;;  %946 = vmatpush.bf16.msrb.mxu2 %v2213_v12  ;;  %v2389_v61 = vor.u32 %v2871_v36, %v2388_v22  ;;  %v2356_v22 = vld [vmem:[%s4224_s3 + $0x1f0] sm:$0xf]  ;;  %v2863_v36 = vld [vmem:[%s4224_s3 + $0x1f4] sm:$0xf0] }
  0xf0   :  { %935 = vmatpush.bf16.msra.mxu3 %v2249_v58 }
  0xf2   :  { %764 = vmatpush.bf16.msra.mxu1 %v2155_v39 }
  0xf3   :  { %920 = vmatpush.bf16.msra.mxu0 %v2193_v14  ;;  %947 = vmatpush.bf16.msrb.mxu2 %v2205_v25 }
  0xf6   :  { %765 = vmatpush.bf16.msra.mxu1 %v2147_v51  ;;  %v2366_v51 = vld [vmem:[%s4224_s3 + $0x208] sm:$0xf0] }
  0xf7   :  { %921 = vmatpush.bf16.msra.mxu0 %v2185_v32  ;;  %948 = vmatpush.bf16.msrb.mxu2 %v2197_v45  ;;  %v2867_v32 = vld [vmem:[%s4224_s3 + $0x214] sm:$0xf0]  ;;  %v2822_v45 = vld [vmem:[%s4224_s3 + $0xb4] sm:$0xf]  ;;  %v2369_v18 = vor.u32 %v2864_v50, %v2366_v51  ;;  %v2856_v50 = vld [vmem:[%s4224_s3 + $0x1c4] sm:$0xf] }
  0xf8   :  { %v2334_v51 = vld [vmem:[%s4224_s3 + $0x1c8] sm:$0xf0] }
  0xfb   :  { %1150 = vmatpush.bf16.msrb.mxu0 %v2413_v34  ;;  %949 = vmatpush.bf16.msrb.mxu2 %v2189_v59  ;;  %v2374_v34 = vld [vmem:[%s4224_s3 + $0x218] sm:$0xf0]  ;;  %v2277_v59 = vor.u32 %v2822_v45, %v2274_v49  ;;  %v2857_v49 = vld [vmem:[%s4224_s3 + $0x1c4] sm:$0xf0] }
  0xfc   :  { %v2377_v44 = vor.u32 %v2866_v33, %v2374_v34  ;;  %v2858_v34 = vld [vmem:[%s4224_s3 + $0x1d4] sm:$0xf] }
  0xff   :  { %1151 = vmatpush.bf16.msrb.mxu0 %v2405_v27 }
 0x103   :  { %1152 = vmatpush.bf16.msrb.mxu0 %v2397_v26  ;;  %v2266_v26 = vld [vmem:[%s4224_s3 + $0xa8] sm:$0xf0] }
 0x107   :  { %1153 = vmatpush.bf16.msrb.mxu0 %v2389_v61  ;;  %v2862_v61 = vld [vmem:[%s4224_s3 + $0x1f4] sm:$0xf] }
 0x10b   :  { %1154 = vmatpush.bf16.msrb.mxu0 %v2381_v6 }
 0x143   :  { %v2949_v28 = vpop.permute.xlu0 %2948 }
 0x144   :  { %v2951_v7 = vunpack.i.h.bf16 %v2949_v28  ;;  %v2950_v10 = vunpack.i.l.bf16 %v2949_v28  ;;  %v2893_v28 = vld [vmem:[%s4224_s3 + $0x2e4] sm:$0xf0] }
 0x146   :  { %v500_v11 = vsel %vm469_vm3, %v2950_v10, %v2951_v7  ;;  %v510_v31 = vmax.f32 %v3395_v4, %v2951_v7  ;;  %v2282_v4 = vld [vmem:[%s4224_s3 + $0xc8] sm:$0xf0] }
 0x147   :  { %v509_v12 = vmax.f32 %v3383_v0, %v500_v11  ;;  %v2824_v0 = vld [vmem:[%s4224_s3 + $0xc4] sm:$0xf]  ;;  %v2357_v11 = vor.u32 %v2863_v36, %v2356_v22  ;;  %v2326_v22 = vld [vmem:[%s4224_s3 + $0x1b8] sm:$0xf0]  ;;  %v2398_v36 = vld [vmem:[%s4224_s3 + $0x248] sm:$0xf0] }
 0x148   :  { %v2285_v38 = vor.u32 %v2824_v0, %v2282_v4 }
 0x149   :  { %v515_v15 = vpack.c.bf16 %v510_v31, %v509_v12  ;;  %v2361_v31 = vor.u32 %v2862_v61, %v2358_v62  ;;  %v2818_v12 = vld [vmem:[%s4224_s3 + $0x94] sm:$0xf]  ;;  %v2472_v61 = vld [vmem:[%s4224_s3 + $0x2a0] sm:$0xf]  ;;  %v2885_v62 = vld [vmem:[%s4224_s3 + $0x2a4] sm:$0xf0] }
 0x14b   :  { %v2954_v57 = vpop.permute.xlu0 %2953  ;;  %v574_v25 = vunpack.c.h.b16 %v515_v15  ;;  %v573_v30 = vunpack.c.l.b16 %v515_v15  ;;  %v2505_v15 = vor.u32 %v2893_v28, %v2504_v3  ;;  %v2969_v3 = vpop.permute.xlu2 %2968  ;;  %v2316_v28 = vld [vmem:[%s4224_s3 + $0x1a0] sm:$0xf] }
 0x14c   :  { %v2956_v13 = vunpack.i.h.bf16 %v2954_v57  ;;  %v2955_v14 = vunpack.i.l.bf16 %v2954_v57  ;;  %v2258_v57 = vld [vmem:[%s4224_s3 + $0x98] sm:$0xf0] }
 0x14e   :  { %v512_v16 = vmax.f32 %v3452_v48, %v2956_v13  ;;  %v501_v17 = vsel %vm469_vm3, %v2955_v14, %v2956_v13  ;;  %v2959_v19 = vpop.permute.xlu1 %2958  ;;  %v2372_v48 = vld [vmem:[%s4224_s3 + $0x210] sm:$0xf]  ;;  %v2348_v13 = vld [vmem:[%s4224_s3 + $0x1e0] sm:$0xf] }
 0x14f   :  { %v511_v20 = vmax.f32 %v3442_v40, %v501_v17  ;;  %v2961_v21 = vunpack.i.h.bf16 %v2959_v19  ;;  %v2960_v23 = vunpack.i.l.bf16 %v2959_v19  ;;  %v2373_v43 = vor.u32 %v2867_v32, %v2372_v48  ;;  %v2860_v17 = vld [vmem:[%s4224_s3 + $0x1e4] sm:$0xf]  ;;  %v2350_v19 = vld [vmem:[%s4224_s3 + $0x1e8] sm:$0xf0]  ;;  %v2859_v32 = vld [vmem:[%s4224_s3 + $0x1d4] sm:$0xf0] }
 0x150   :  { %v2353_v48 = vor.u32 %v2860_v17, %v2350_v19  ;;  %v2971_v17 = vunpack.i.h.bf16 %v2969_v3  ;;  %v2970_v19 = vunpack.i.l.bf16 %v2969_v3  ;;  %v2896_v3 = vld [vmem:[%s4224_s3 + $0x304] sm:$0xf] }
 0x151   :  { %v3718_v24 = vpack.c.bf16 %v512_v16, %v511_v20  ;;  %v470_v40 = vsel %vm469_vm3, %v2960_v23, %v2961_v21  ;;  %v477_v39 = vmax.f32 %v3464_v55, %v2961_v21  ;;  %v2865_v55 = vld [vmem:[%s4224_s3 + $0x204] sm:$0xf0]  ;;  %v2496_v20 = vld [vmem:[%s4224_s3 + $0x2d0] sm:$0xf]  ;;  %v2891_v21 = vld [vmem:[%s4224_s3 + $0x2d4] sm:$0xf0]  ;;  %v2261_v23 = vor.u32 %v2818_v12, %v2258_v57 }
 0x152   :  { %v476_v41 = vmax.f32 %v3460_v54, %v470_v40  ;;  %v2364_v54 = vld [vmem:[%s4224_s3 + $0x200] sm:$0xf]  ;;  %v2861_v16 = vld [vmem:[%s4224_s3 + $0x1e4] sm:$0xf0]  ;;  %v2250_v40 = vld [vmem:[%s4224_s3 + $0x88] sm:$0xf0]  ;;  %v2497_v33 = vor.u32 %v2891_v21, %v2496_v20 }
 0x153   :  { %v576_v29 = vunpack.c.h.b16 %v3718_v24  ;;  %v575_v63 = vunpack.c.l.b16 %v3718_v24  ;;  %v2365_v60 = vor.u32 %v2865_v55, %v2364_v54  ;;  %v2349_v4 = vor.u32 %v2861_v16, %v2348_v13  ;;  %v2390_v16 = vld [vmem:[%s4224_s3 + $0x238] sm:$0xf0]  ;;  %v2544_v20 = vld [vmem:[%s4224_s3 + $0x330] sm:$0xf]  ;;  %v2903_v21 = vld [vmem:[%s4224_s3 + $0x334] sm:$0xf0] }
 0x154   :  { %v480_v56 = vpack.c.bf16 %v477_v39, %v476_v41  ;;  %v2414_v41 = vld [vmem:[%s4224_s3 + $0x268] sm:$0xf0]  ;;  %v2473_v13 = vor.u32 %v2885_v62, %v2472_v61  ;;  %v2897_v61 = vld [vmem:[%s4224_s3 + $0x304] sm:$0xf0] }
 0x155   :  { %v577_v35 = vpack.c.b16 %v575_v63, %v573_v30  ;;  %v3745_v37 = vpack.c.b16 %v576_v29, %v574_v25  ;;  %v2816_v25 = vld [vmem:[%s4224_s3 + $0x84] sm:$0xf]  ;;  %v2340_v30 = vld [vmem:[%s4224_s3 + $0x1d0] sm:$0xf] }
 0x156   :  { %v2964_v42 = vpop.permute.xlu1 %2963  ;;  %v774_v6 = vunpack.c.l.b16 %v480_v56  ;;  %v775_v39 = vunpack.c.h.b16 %v480_v56  ;;  %v2480_v56 = vld [vmem:[%s4224_s3 + $0x2b0] sm:$0xf] }
 0x157   :  { %v2966_v5 = vunpack.i.h.bf16 %v2964_v42  ;;  %v2965_v46 = vunpack.i.l.bf16 %v2964_v42  ;;  %v579_v27 = vrot.slane %v577_v35, 3  ;;  %v580_v47 = vrot.slane %v3745_v37, 3  ;;  %v2342_v35 = vld [vmem:[%s4224_s3 + $0x1d8] sm:$0xf0]  ;;  %v2488_v42 = vld [vmem:[%s4224_s3 + $0x2c0] sm:$0xf] }
 0x159   :  { %v479_v52 = vmax.f32 %v3496_v9, %v2966_v5  ;;  %v471_v53 = vsel %vm469_vm3, %v2965_v46, %v2966_v5  ;;  %724 = vmatmul.bf16.vlgmr.msrb.gmra.mxu1 %v579_v27  ;;  %2180 = vmatmul.msk.bf16.vlgmr.msrb.gmra.mxu3 %vm712_vm4, %v580_v47  ;;  %v2820_v9 = vld [vmem:[%s4224_s3 + $0xa4] sm:$0xf]  ;;  %v2341_v5 = vor.u32 %v2859_v32, %v2340_v30 }
 0x15a   :  { %v478_v58 = vmax.f32 %v3493_v8, %v471_v53  ;;  %752 = vmatmul.bf16.vlgmr.msra.gmra.mxu2 %v579_v27  ;;  %959 = vmatpush.bf16.msrb.mxu1 %v2285_v38  ;;  %v2269_v10 = vor.u32 %v2820_v9, %v2266_v26  ;;  %v2876_v38 = vld [vmem:[%s4224_s3 + $0x264] sm:$0xf]  ;;  %v2345_v46 = vor.u32 %v2858_v34, %v2342_v35  ;;  %v2332_v27 = vld [vmem:[%s4224_s3 + $0x1c0] sm:$0xf]  ;;  %v2406_v53 = vld [vmem:[%s4224_s3 + $0x258] sm:$0xf0] }
 0x15b   :  { %1133 = vmatpush.bf16.msrb.mxu3 %v2373_v43  ;;  %1161 = vmatpush.bf16.msra.mxu2 %v2377_v44  ;;  %v2889_v43 = vld [vmem:[%s4224_s3 + $0x2c4] sm:$0xf0]  ;;  %v2253_v44 = vor.u32 %v2816_v25, %v2250_v40  ;;  %v2417_v54 = vor.u32 %v2876_v38, %v2414_v41  ;;  %v2333_v37 = vor.u32 %v2857_v49, %v2332_v27  ;;  %v2854_v26 = vld [vmem:[%s4224_s3 + $0x1b4] sm:$0xf]  ;;  %v2546_v25 = vld [vmem:[%s4224_s3 + $0x338] sm:$0xf0] }
 0x15c   :  { %v481_v8 = vpack.c.bf16 %v479_v52, %v478_v58  ;;  %v2489_v55 = vor.u32 %v2889_v43, %v2488_v42  ;;  %v2874_v52 = vld [vmem:[%s4224_s3 + $0x254] sm:$0xf]  ;;  %v2887_v58 = vld [vmem:[%s4224_s3 + $0x2b4] sm:$0xf0]  ;;  %v2545_v32 = vor.u32 %v2903_v21, %v2544_v20  ;;  %v2382_v34 = vld [vmem:[%s4224_s3 + $0x228] sm:$0xf0]  ;;  %v502_v35 = vsel %vm469_vm3, %v2970_v19, %v2971_v17 }
 0x15d   :  { %v2481_v9 = vor.u32 %v2887_v58, %v2480_v56  ;;  %v2536_v41 = vld [vmem:[%s4224_s3 + $0x320] sm:$0xf]  ;;  %v2901_v42 = vld [vmem:[%s4224_s3 + $0x324] sm:$0xf0]  ;;  %v2900_v43 = vld [vmem:[%s4224_s3 + $0x324] sm:$0xf]  ;;  %v514_v27 = vmax.f32 %v3482_v1, %v2971_v17 }
 0x15e   :  { %v776_v7 = vunpack.c.l.b16 %v481_v8  ;;  %960 = vmatpush.bf16.msrb.mxu1 %v2277_v59  ;;  %v777_v0 = vunpack.c.h.b16 %v481_v8  ;;  %v2324_v59 = vld [vmem:[%s4224_s3 + $0x1b0] sm:$0xf]  ;;  %v2872_v8 = vld [vmem:[%s4224_s3 + $0x244] sm:$0xf]  ;;  %v2899_v58 = vld [vmem:[%s4224_s3 + $0x314] sm:$0xf0] }
 0x15f   :  { %1134 = vmatpush.bf16.msrb.mxu3 %v2365_v60  ;;  %1162 = vmatpush.bf16.msra.mxu2 %v2369_v18  ;;  %v2855_v60 = vld [vmem:[%s4224_s3 + $0x1b4] sm:$0xf0]  ;;  %v2409_v18 = vor.u32 %v2874_v52, %v2406_v53  ;;  %v2401_v57 = vor.u32 %v2872_v8, %v2398_v36  ;;  %v2892_v49 = vld [vmem:[%s4224_s3 + $0x2e4] sm:$0xf]  ;;  %v2537_v52 = vor.u32 %v2901_v42, %v2536_v41  ;;  %v2528_v56 = vld [vmem:[%s4224_s3 + $0x310] sm:$0xf] }
 0x160   :  { %v3807_v14 = vpack.c.b16 %v776_v7, %v774_v6  ;;  %v3855_v45 = vpack.c.b16 %v777_v0, %v775_v39  ;;  %v2325_v6 = vor.u32 %v2855_v60, %v2324_v59  ;;  %v2329_v7 = vor.u32 %v2854_v26, %v2326_v22  ;;  %v2464_v0 = vld [vmem:[%s4224_s3 + $0x290] sm:$0xf]  ;;  %v2879_v59 = vld [vmem:[%s4224_s3 + $0x274] sm:$0xf0]  ;;  %v2890_v60 = vld [vmem:[%s4224_s3 + $0x2d4] sm:$0xf] }
 0x161   :  { %v2529_v26 = vor.u32 %v2899_v58, %v2528_v56  ;;  %v2520_v36 = vld [vmem:[%s4224_s3 + $0x300] sm:$0xf]  ;;  %v2894_v17 = vld [vmem:[%s4224_s3 + $0x2f4] sm:$0xf]  ;;  %v2514_v19 = vld [vmem:[%s4224_s3 + $0x2f8] sm:$0xf0] }
 0x162   :  { %961 = vmatpush.bf16.msrb.mxu1 %v2269_v10  ;;  %922 = vmatmul.bf16.vlgmr.msra.gmra.mxu0 %v3807_v14  ;;  %v2853_v10 = vld [vmem:[%s4224_s3 + $0x1a4] sm:$0xf0]  ;;  %v998_v12 = vrot.slane %v3855_v45, 1  ;;  %v2886_v20 = vld [vmem:[%s4224_s3 + $0x2b4] sm:$0xf] }
 0x163   :  { %1135 = vmatpush.bf16.msrb.mxu3 %v2357_v11  ;;  %1163 = vmatpush.bf16.msra.mxu2 %v2361_v31  ;;  %v2852_v11 = vld [vmem:[%s4224_s3 + $0x1a4] sm:$0xf]  ;;  %v2318_v31 = vld [vmem:[%s4224_s3 + $0x1a8] sm:$0xf0]  ;;  %v2482_v21 = vld [vmem:[%s4224_s3 + $0x2b8] sm:$0xf0] }
 0x164   :  { %1359 = vmatpush.bf16.msra.mxu0 %v2505_v15  ;;  %v2870_v15 = vld [vmem:[%s4224_s3 + $0x234] sm:$0xf]  ;;  %v2321_v40 = vor.u32 %v2852_v11, %v2318_v31  ;;  %v2521_v11 = vor.u32 %v2897_v61, %v2520_v36  ;;  %v2919_v36 = vld [vmem:[%s4226_s5 + $0x78] sm:$0xff] }
 0x165   :  { %v2393_v30 = vor.u32 %v2870_v15, %v2390_v16  ;;  %v2927_v61 = vld [vmem:[%s4226_s5 + $0xb8] sm:$0xff] }
 0x166   :  { %962 = vmatpush.bf16.msrb.mxu1 %v2261_v23  ;;  %v2902_v23 = vld [vmem:[%s4224_s3 + $0x334] sm:$0xf] }
 0x167   :  { %1136 = vmatpush.bf16.msrb.mxu3 %v2349_v4  ;;  %1164 = vmatpush.bf16.msra.mxu2 %v2353_v48  ;;  %v2883_v4 = vld [vmem:[%s4224_s3 + $0x294] sm:$0xf0]  ;;  %v2317_v48 = vor.u32 %v2853_v10, %v2316_v28  ;;  %v2549_v38 = vor.u32 %v2902_v23, %v2546_v25  ;;  %v2522_v28 = vld [vmem:[%s4224_s3 + $0x308] sm:$0xf0]  ;;  %v2517_v23 = vor.u32 %v2894_v17, %v2514_v19 }
 0x168   :  { %1360 = vmatpush.bf16.msra.mxu0 %v2497_v33  ;;  %v2868_v33 = vld [vmem:[%s4224_s3 + $0x224] sm:$0xf]  ;;  %v2465_v39 = vor.u32 %v2883_v4, %v2464_v0  ;;  %v2525_v31 = vor.u32 %v2896_v3, %v2522_v28  ;;  %v2485_v25 = vor.u32 %v2886_v20, %v2482_v21  ;;  %v2910_v3 = vld [vmem:[%s4226_s5 + $0x30] sm:$0xff] }
 0x169   :  { %2181 = vmatmul.msk.bf16.vlgmr.msra.gmra.mxu1 %vm712_vm4, %v580_v47  ;;  %2286 = vmatmul.msk.bf16.vlgmr.msra.gmra.mxu3 %vm712_vm4, %v3855_v45  ;;  %v2337_v47 = vor.u32 %v2856_v50, %v2334_v51  ;;  %v997_v50 = vrot.slane %v3807_v14, 1  ;;  %v2385_v51 = vor.u32 %v2868_v33, %v2382_v34  ;;  %v2884_v4 = vld [vmem:[%s4224_s3 + $0x2a4] sm:$0xf]  ;;  %v2466_v33 = vld [vmem:[%s4224_s3 + $0x298] sm:$0xf0]  ;;  %v2918_v28 = vld [vmem:[%s4226_s5 + $0x70] sm:$0xff] }
 0x16a   :  { %950 = vmatmul.bf16.vlgmr.msrb.gmra.mxu2 %v3807_v14  ;;  %963 = vmatpush.bf16.msrb.mxu1 %v2253_v44  ;;  %v2538_v44 = vld [vmem:[%s4224_s3 + $0x328] sm:$0xf0]  ;;  %v2878_v34 = vld [vmem:[%s4224_s3 + $0x274] sm:$0xf] }
 0x16b   :  { %1137 = vmatpush.bf16.msrb.mxu3 %v2341_v5  ;;  %1165 = vmatpush.bf16.msra.mxu2 %v2345_v46  ;;  %v2456_v5 = vld [vmem:[%s4224_s3 + $0x280] sm:$0xf]  ;;  %v2881_v46 = vld [vmem:[%s4224_s3 + $0x284] sm:$0xf0]  ;;  %v2541_v1 = vor.u32 %v2900_v43, %v2538_v44 }
 0x16c   :  { %1361 = vmatpush.bf16.msra.mxu0 %v2489_v55  ;;  %v513_v55 = vmax.f32 %v3486_v2, %v502_v35  ;;  %v2457_v53 = vor.u32 %v2881_v46, %v2456_v5  ;;  %v2898_v2 = vld [vmem:[%s4224_s3 + $0x314] sm:$0xf]  ;;  %v2450_v35 = vld [vmem:[%s4224_s3 + $0x278] sm:$0xf0] }
 0x16e   :  { %1178 = vmatpush.bf16.msra.mxu1 %v2417_v54  ;;  %v2506_v54 = vld [vmem:[%s4224_s3 + $0x2e8] sm:$0xf0] }
 0x16f   :  { %1138 = vmatpush.bf16.msrb.mxu3 %v2333_v37  ;;  %1166 = vmatpush.bf16.msra.mxu2 %v2337_v47  ;;  %v2509_v14 = vor.u32 %v2892_v49, %v2506_v54  ;;  %v2530_v37 = vld [vmem:[%s4224_s3 + $0x318] sm:$0xf0]  ;;  %v2448_v47 = vld [vmem:[%s4224_s3 + $0x270] sm:$0xf] }
 0x170   :  { %1362 = vmatpush.bf16.msra.mxu0 %v2481_v9  ;;  %v517_v9 = vpack.c.bf16 %v514_v27, %v513_v55  ;;  %v2533_v22 = vor.u32 %v2898_v2, %v2530_v37  ;;  %v2449_v8 = vor.u32 %v2879_v59, %v2448_v47 }
 0x172   :  { %1179 = vmatpush.bf16.msra.mxu1 %v2409_v18  ;;  %2418 = vmatmul.msk.bf16.vlgmr.msrb.gmra.mxu0 %vm712_vm4, %v998_v12  ;;  %v2498_v18 = vld [vmem:[%s4224_s3 + $0x2d8] sm:$0xf0]  ;;  %v1221_v10 = vunpack.c.l.b16 %v517_v9  ;;  %v1222_v0 = vunpack.c.h.b16 %v517_v9 }
 0x173   :  { %1139 = vmatpush.bf16.msrb.mxu3 %v2325_v6  ;;  %1167 = vmatpush.bf16.msra.mxu2 %v2329_v7  ;;  %v2501_v62 = vor.u32 %v2890_v60, %v2498_v18  ;;  %v2888_v6 = vld [vmem:[%s4224_s3 + $0x2c4] sm:$0xf]  ;;  %v2490_v7 = vld [vmem:[%s4224_s3 + $0x2c8] sm:$0xf0] }
 0x174   :  { %1363 = vmatpush.bf16.msra.mxu0 %v2473_v13  ;;  %v2895_v13 = vld [vmem:[%s4224_s3 + $0x2f4] sm:$0xf0]  ;;  %v1223_v15 = vpack.c.b16 %v1221_v10, %v575_v63  ;;  %v2493_v16 = vor.u32 %v2888_v6, %v2490_v7  ;;  %v2926_v10 = vld [vmem:[%s4226_s5 + $0xb0] sm:$0xff] }
 0x176   :  { %1180 = vmatpush.bf16.msra.mxu1 %v2401_v57  ;;  %v2512_v57 = vld [vmem:[%s4224_s3 + $0x2f0] sm:$0xf] }
 0x177   :  { %1140 = vmatpush.bf16.msrb.mxu3 %v2317_v48  ;;  %1168 = vmatpush.bf16.msra.mxu2 %v2321_v40  ;;  %v2513_v63 = vor.u32 %v2895_v13, %v2512_v57  ;;  %v2474_v48 = vld [vmem:[%s4224_s3 + $0x2a8] sm:$0xf0]  ;;  %v1224_v40 = vpack.c.b16 %v1222_v0, %v576_v29  ;;  %v2880_v29 = vld [vmem:[%s4224_s3 + $0x284] sm:$0xf] }
 0x178   :  { %1364 = vmatpush.bf16.msra.mxu0 %v2465_v39 }
 0x179   :  { %2287 = vmatmul.msk.bf16.vlgmr.msrb.gmra.mxu1 %vm712_vm4, %v3855_v45  ;;  %v2458_v45 = vld [vmem:[%s4224_s3 + $0x288] sm:$0xf0] }
 0x17a   :  { %1181 = vmatpush.bf16.msra.mxu1 %v2393_v30  ;;  %1141 = vmatmul.bf16.vlgmr.msrb.gmra.mxu3 %v997_v50  ;;  %v2477_v30 = vor.u32 %v2884_v4, %v2474_v48 }
 0x17b   :  { %1376 = vmatpush.bf16.msra.mxu3 %v2545_v32  ;;  %1404 = vmatpush.bf16.msrb.mxu2 %v2549_v38  ;;  %v2882_v32 = vld [vmem:[%s4224_s3 + $0x294] sm:$0xf]  ;;  %v2453_v38 = vor.u32 %v2878_v34, %v2450_v35  ;;  %v2908_v35 = vld [vmem:[%s4226_s5 + $0x20] sm:$0xff] }
 0x17c   :  { %1169 = vmatmul.bf16.vlgmr.msra.gmra.mxu2 %v997_v50  ;;  %1365 = vmatpush.bf16.msra.mxu0 %v2457_v53  ;;  %v2469_v24 = vor.u32 %v2882_v32, %v2466_v33  ;;  %v1419_v32 = vld [vmem:[%s4225_s4] sm:$0x3] }
 0x17e   :  { %1182 = vmatpush.bf16.msra.mxu1 %v2385_v51 }
 0x17f   :  { %1377 = vmatpush.bf16.msra.mxu3 %v2537_v52  ;;  %1405 = vmatpush.bf16.msrb.mxu2 %v2541_v1 }
 0x180   :  { %1366 = vmatpush.bf16.msra.mxu0 %v2449_v8  ;;  %v2911_v8 = vld [vmem:[%s4226_s5 + $0x38] sm:$0xff] }
 0x182   :  { %1387 = vmatpush.bf16.msrb.mxu1 %v2509_v14 }
 0x183   :  { %1378 = vmatpush.bf16.msra.mxu3 %v2529_v26  ;;  %1406 = vmatpush.bf16.msrb.mxu2 %v2533_v22 }
 0x184   :  { %1367 = vmatmul.bf16.vlgmr.msra.gmra.mxu0 %v1223_v15 }
 0x185   :  { %1606 = vmatpush.bf16.msrb.mxu0 %v2911_v8 }
 0x186   :  { %1388 = vmatpush.bf16.msrb.mxu1 %v2501_v62  ;;  %v2935_v62 = vld [vmem:[%s4226_s5 + $0xf8] sm:$0xff] }
 0x187   :  { %1379 = vmatpush.bf16.msra.mxu3 %v2521_v11  ;;  %1407 = vmatpush.bf16.msrb.mxu2 %v2525_v31  ;;  %v2934_v11 = vld [vmem:[%s4226_s5 + $0xf0] sm:$0xff] }
 0x189   :  { %2419 = vmatmul.msk.bf16.vlgmr.msra.gmra.mxu1 %vm712_vm4, %v998_v12  ;;  %v2461_v12 = vor.u32 %v2880_v29, %v2458_v45  ;;  %1607 = vmatpush.bf16.msrb.mxu0 %v2910_v3 }
 0x18a   :  { %1389 = vmatpush.bf16.msrb.mxu1 %v2493_v16 }
 0x18b   :  { %1380 = vmatpush.bf16.msra.mxu3 %v2513_v63  ;;  %1408 = vmatpush.bf16.msrb.mxu2 %v2517_v23  ;;  %v2909_v23 = vld [vmem:[%s4226_s5 + $0x28] sm:$0xff] }
 0x18d   :  { %1608 = vmatpush.bf16.msrb.mxu0 %v2909_v23  ;;  %v2943_v23 = vld [vmem:[%s4228_s7 + $0x38] sm:$0xff] }
 0x18e   :  { %1390 = vmatpush.bf16.msrb.mxu1 %v2485_v25  ;;  %2550 = vmatmul.msk.bf16.vlgmr.msra.gmra.mxu3 %vm712_vm4, %v1224_v40  ;;  %v2917_v25 = vld [vmem:[%s4226_s5 + $0x68] sm:$0xff] }
 0x18f   :  { %2551 = vmatmul.msk.bf16.vlgmr.msrb.gmra.mxu2 %vm712_vm4, %v1224_v40  ;;  %1545 = vmatpush.bf16.msrb.mxu3 %v2919_v36  ;;  %v2925_v40 = vld [vmem:[%s4226_s5 + $0xa8] sm:$0xff] }
 0x190   :  { %1686 = vmatpush.bf16.msra.mxu2 %v2927_v61 }
 0x191   :  { %1609 = vmatpush.bf16.msrb.mxu0 %v2908_v35  ;;  %v2940_v35 = vld [vmem:[%s4228_s7 + $0x20] sm:$0xff] }
 0x192   :  { %1391 = vmatpush.bf16.msrb.mxu1 %v2477_v30  ;;  %v2933_v30 = vld [vmem:[%s4226_s5 + $0xe8] sm:$0xff] }
 0x193   :  { %1546 = vmatpush.bf16.msrb.mxu3 %v2918_v28 }
 0x194   :  { %1687 = vmatpush.bf16.msra.mxu2 %v2926_v10 }
 0x196   :  { %1392 = vmatpush.bf16.msrb.mxu1 %v2469_v24 }
 0x197   :  { %1547 = vmatpush.bf16.msrb.mxu3 %v2917_v25  ;;  %v2942_v25 = vld [vmem:[%s4228_s7 + $0x30] sm:$0xff] }
 0x198   :  { %1688 = vmatpush.bf16.msra.mxu2 %v2925_v40 }
 0x19a   :  { %1393 = vmatpush.bf16.msrb.mxu1 %v2461_v12 }
 0x19e   :  { %1394 = vmatpush.bf16.msrb.mxu1 %v2453_v38  ;;  %v2916_v38 = vld [vmem:[%s4226_s5 + $0x60] sm:$0xff] }
 0x19f   :  { %1548 = vmatpush.bf16.msrb.mxu3 %v2916_v38  ;;  %v2939_v38 = vld [vmem:[%s4228_s7 + $0x18] sm:$0xff] }
 0x1a1   :  { %1395 = vmatmul.bf16.vlgmr.msrb.gmra.mxu1 %v1223_v15 }
 0x1a2   :  { %1767 = vmatpush.bf16.msra.mxu1 %v2935_v62 }
 0x1a6   :  { %1768 = vmatpush.bf16.msra.mxu1 %v2934_v11  ;;  %v2905_v11 = vld [vmem:[%s4226_s5 + $0x8] sm:$0xff] }
 0x1aa   :  { %1769 = vmatpush.bf16.msra.mxu1 %v2933_v30 }
 0x1d6   :  { %v725_v39 = vpop.f32.mrf.mxu1 }
 0x1dc   :  { %v739_v41 = vpop.f32.mrf.mxu3 }
 0x1dd   :  { %v753_v42 = vpop.f32.mrf.mxu2  ;;  %v740_v22 = vadd.f32 %v739_v41, %v725_v39 }
 0x1de   :  { %v727_v43 = vpop.f32.mrf.mxu1 }
 0x1df   :  { %v923_v44 = vpop.f32.mrf.mxu0 }
 0x1e0   :  { %v924_v31 = vadd.f32 %v923_v44, %v740_v22  ;;  %v2932_v44 = vld [vmem:[%s4226_s5 + $0xe0] sm:$0xff] }
 0x1e1   :  { %1770 = vmatpush.bf16.msra.mxu1 %v2932_v44 }
 0x1e4   :  { %v741_v5 = vpop.f32.mrf.mxu3 }
 0x1e5   :  { %v4080_v46 = vpop.f32.mrf.mxu2  ;;  %v742_v26 = vadd.f32 %v741_v5, %v727_v43  ;;  %v2924_v43 = vld [vmem:[%s4226_s5 + $0xa0] sm:$0xff] }
 0x1e6   :  { %v767_v27 = vpop.f32.mrf.mxu1  ;;  %1689 = vmatpush.bf16.msra.mxu2 %v2924_v43 }
 0x1e7   :  { %v925_v54 = vpop.f32.mrf.mxu0  ;;  %v768_v57 = vadd.f32 %v767_v27, %v753_v42  ;;  %v1421_v42 = vperm.slane %v1419_v32, 0 }
 0x1e8   :  { %v926_v6 = vadd.f32 %v925_v54, %v742_v26  ;;  %v1422_v54 = vperm.slane %v1419_v32, 1 }
 0x1ec   :  { %v937_v49 = vpop.f32.mrf.mxu3 }
 0x1ed   :  { %v951_v50 = vpop.f32.mrf.mxu2  ;;  %v938_v20 = vadd.f32 %v937_v49, %v924_v31  ;;  %v2914_v31 = vld [vmem:[%s4226_s5 + $0x50] sm:$0xff] }
 0x1ee   :  { %v769_v55 = vpop.f32.mrf.mxu1  ;;  %v952_v21 = vadd.f32 %v951_v50, %v768_v57  ;;  %v2915_v50 = vld [vmem:[%s4226_s5 + $0x58] sm:$0xff]  ;;  %v2922_v57 = vld [vmem:[%s4226_s5 + $0x90] sm:$0xff] }
 0x1ef   :  { %v1156_v1 = vpop.f32.mrf.mxu0  ;;  %v770_v34 = vadd.f32 %v769_v55, %v4080_v46  ;;  %v2907_v55 = vld [vmem:[%s4226_s5 + $0x18] sm:$0xff]  ;;  %1549 = vmatpush.bf16.msrb.mxu3 %v2915_v50 }
 0x1f0   :  { %1610 = vmatpush.bf16.msrb.mxu0 %v2907_v55  ;;  %v2977_v55 = vld [vmem:[%s4227_s6] ss:$0 sm:$0xff] }
 0x1f3   :  { %1550 = vmatpush.bf16.msrb.mxu3 %v2914_v31 }
 0x1f4   :  { %v939_v51 = vpop.f32.mrf.mxu3 }
 0x1f5   :  { %v4082_v53 = vpop.f32.mrf.mxu2  ;;  %v940_v16 = vadd.f32 %v939_v51, %v926_v6 }
 0x1f6   :  { %v965_v52 = vpop.f32.mrf.mxu1  ;;  %v954_v5 = vadd.f32 %v4082_v53, %v770_v34  ;;  %v2931_v53 = vld [vmem:[%s4226_s5 + $0xd8] sm:$0xff]  ;;  %v2941_v34 = vld [vmem:[%s4228_s7 + $0x28] sm:$0xff] }
 0x1f7   :  { %v1158_v2 = vpop.f32.mrf.mxu0  ;;  %v966_v24 = vadd.f32 %v965_v52, %v952_v21  ;;  %1771 = vmatpush.bf16.msra.mxu1 %v2931_v53  ;;  %v2920_v21 = vld [vmem:[%s4226_s5 + $0x80] sm:$0xff] }
 0x1fd   :  { %v1142_v56 = vpop.f32.mrf.mxu3 }
 0x1fe   :  { %v4084_v58 = vpop.f32.mrf.mxu1  ;;  %v1157_v17 = vadd.f32 %v1156_v1, %v1142_v56  ;;  %v2923_v1 = vld [vmem:[%s4226_s5 + $0x98] sm:$0xff] }
 0x1ff   :  { %v1170_v14 = vpop.f32.mrf.mxu2  ;;  %v968_v51 = vadd.f32 %v4084_v58, %v954_v5  ;;  %v2906_v58 = vld [vmem:[%s4226_s5 + $0x10] sm:$0xff]  ;;  %1690 = vmatpush.bf16.msra.mxu2 %v2923_v1 }
 0x200   :  { %v1189_v29 = vadd.f32 %v1157_v17, %v938_v20  ;;  %1611 = vmatpush.bf16.msrb.mxu0 %v2906_v58  ;;  %v2921_v17 = vld [vmem:[%s4226_s5 + $0x88] sm:$0xff]  ;;  %v2912_v20 = vld [vmem:[%s4226_s5 + $0x40] sm:$0xff] }
 0x201   :  { %v1368_v59 = vpop.f32.mrf.mxu0 }
 0x203   :  { %1691 = vmatpush.bf16.msra.mxu2 %v2922_v57 }
 0x204   :  { %1612 = vmatpush.bf16.msrb.mxu0 %v2905_v11 }
 0x205   :  { %v1144_v37 = vpop.f32.mrf.mxu3 }
 0x206   :  { %v1184_v47 = vpop.f32.mrf.mxu1  ;;  %v1159_v7 = vadd.f32 %v1158_v2, %v1144_v37 }
 0x207   :  { %v1172_v60 = vpop.f32.mrf.mxu2  ;;  %v1185_v4 = vadd.f32 %v1184_v47, %v1170_v14  ;;  %1692 = vmatpush.bf16.msra.mxu2 %v2921_v17 }
 0x208   :  { %v1191_v0 = vadd.f32 %v1159_v7, %v940_v16  ;;  %v2913_v16 = vld [vmem:[%s4226_s5 + $0x48] sm:$0xff] }
 0x209   :  { %v1370_v13 = vpop.f32.mrf.mxu0  ;;  %v1190_v39 = vadd.f32 %v1185_v4, %v966_v24  ;;  %1551 = vmatpush.bf16.msrb.mxu3 %v2913_v16 }
 0x20b   :  { %1693 = vmatpush.bf16.msra.mxu2 %v2920_v21 }
 0x20d   :  { %1552 = vmatpush.bf16.msrb.mxu3 %v2912_v20 }
 0x20e   :  { %v1186_v9 = vpop.f32.mrf.mxu1 }
 0x20f   :  { %v1187_v46 = vadd.f32 %v1186_v9, %v1172_v60 }
 0x211   :  { %v1382_v18 = vpop.f32.mrf.mxu3  ;;  %v1192_v14 = vadd.f32 %v1187_v46, %v968_v51  ;;  %1856 = vmatpush.bf16.msra.mxu3 %v2943_v23 }
 0x212   :  { %v1410_v63 = vpop.f32.mrf.mxu2  ;;  %v1383_v48 = vadd.f32 %v1382_v18, %v1368_v59 }
 0x214   :  { %v1415_v41 = vadd.f32 %v1383_v48, %v1189_v29 }
 0x215   :  { %1857 = vmatpush.bf16.msra.mxu3 %v2942_v25 }
 0x216   :  { %v1425_v52 = vadd.f32 %v1421_v42, %v1415_v41  ;;  %v2937_v41 = vld [vmem:[%s4228_s7 + $0x8] sm:$0xff] }
 0x218   :  { %v1429_v60 = vmax.f32 %v1425_v52, 0.0 }
 0x219   :  { %v1384_v15 = vpop.f32.mrf.mxu3  ;;  %1858 = vmatpush.bf16.msra.mxu3 %v2941_v34 }
 0x21a   :  { %v1385_v19 = vadd.f32 %v1384_v15, %v1370_v13  ;;  %v1412_v56 = vpop.f32.mrf.mxu2  ;;  %v1438_v8 = vrot.slane %v1429_v60, 2  ;;  %v2930_v13 = vld [vmem:[%s4226_s5 + $0xd0] sm:$0xff]  ;;  %v2904_v15 = vld [vmem:[%s4226_s5] sm:$0xff] }
 0x21b   :  { %1772 = vmatpush.bf16.msra.mxu1 %v2930_v13  ;;  %1613 = vmatpush.bf16.msrb.mxu0 %v2904_v15 }
 0x21c   :  { %v1417_v45 = vadd.f32 %v1385_v19, %v1191_v0  ;;  %v2929_v19 = vld [vmem:[%s4226_s5 + $0xc8] sm:$0xff] }
 0x21d   :  { %1859 = vmatpush.bf16.msra.mxu3 %v2940_v35 }
 0x21e   :  { %v1396_v33 = vpop.f32.mrf.mxu1  ;;  %v1427_v27 = vadd.f32 %v1421_v42, %v1417_v45  ;;  %v2936_v42 = vld [vmem:[%s4228_s7] sm:$0xff] }
 0x21f   :  { %v1411_v12 = vadd.f32 %v1410_v63, %v1396_v33  ;;  %1773 = vmatpush.bf16.msra.mxu1 %v2929_v19  ;;  %v2928_v63 = vld [vmem:[%s4226_s5 + $0xc0] sm:$0xff] }
 0x220   :  { %v1431_v37 = vmax.f32 %v1427_v27, 0.0 }
 0x221   :  { %v1416_v49 = vadd.f32 %v1411_v12, %v1190_v39  ;;  %1860 = vmatpush.bf16.msra.mxu3 %v2939_v38  ;;  %v2938_v39 = vld [vmem:[%s4228_s7 + $0x10] sm:$0xff] }
 0x222   :  { %v1439_v9 = vrot.slane %v1431_v37, 2 }
 0x223   :  { %v1426_v47 = vadd.f32 %v1422_v54, %v1416_v49  ;;  %1774 = vmatpush.bf16.msra.mxu1 %v2928_v63 }
 0x224   :  { %v1440_v3 = vsel %vm1437_vm5, %v1438_v8, %v1439_v9 }
 0x225   :  { %v1430_v26 = vmax.f32 %v1426_v47, 0.0  ;;  %v1446_v6 = vmax.f32 %v1429_v60, %v1440_v3  ;;  %1861 = vmatpush.bf16.msra.mxu3 %v2938_v39 }
 0x226   :  { %v1398_v2 = vpop.f32.mrf.mxu1 }
 0x227   :  { %v1413_v59 = vadd.f32 %v1412_v56, %v1398_v2  ;;  %v1441_v61 = vrot.slane %v1430_v26, 2 }
 0x229   :  { %v1418_v18 = vadd.f32 %v1413_v59, %v1192_v14  ;;  %1862 = vmatpush.bf16.msra.mxu3 %v2937_v41  ;;  %v2978_v14 = vld [vmem:[%s4229_s8] ss:$0 sm:$0xff] }
 0x22b   :  { %v1428_v22 = vadd.f32 %v1422_v54, %v1418_v18 }
 0x22d   :  { %v1432_v36 = vmax.f32 %v1428_v22, 0.0  ;;  %1863 = vmatpush.bf16.msra.mxu3 %v2936_v42 }
 0x22f   :  { %v1442_v62 = vrot.slane %v1432_v36, 2 }
 0x231   :  { %v1443_v28 = vsel %vm1437_vm5, %v1441_v61, %v1442_v62 }
 0x232   :  { %v1447_v7 = vmax.f32 %v1430_v26, %v1443_v28 }
 0x234   :  { %v2972_v10 = vpack.i.bf16 %v1447_v7, %v1446_v6 }
 0x236   :  { %2973 = vrot.lane.b32.xlu2 %v2972_v10, %s3006_s23 }
 0x290   :  { %v2974_v0 = vpop.permute.xlu2 %2973 }
 0x291   :  { %v2976_v4 = vunpack.i.h.bf16 %v2974_v0  ;;  %v2975_v48 = vunpack.i.l.bf16 %v2974_v0 }
 0x293   :  { %v1455_v40 = vsel %vm1454_vm6, %v2975_v48, %v2976_v4 }
 0x294   :  { %v1457_v30 = vmax.f32 %v1446_v6, %v1455_v40 }
 0x296   :  { %v1458_v32 = vpack.c.bf16 %v1457_v30, %v1457_v30 }
 0x298   :  { %v1493_v33 = vunpack.c.l.b16 %v1458_v32  ;;  %1614 = vmatmul.bf16.vlgmr.msrb.gmra.mxu0 %v1458_v32 }
 0x29a   :  { %v1494_v24 = vpack.c.b16 %v1493_v33, %v1493_v33 }
 0x29c   :  { %v1495_v29 = vrot.slane %v1494_v24, 1  ;;  %v1636_v45 = vrot.slane %v1494_v24, 2  ;;  %v1717_v12 = vrot.slane %v1494_v24, 3 }
 0x29e   :  { %1553 = vmatmul.bf16.vlgmr.msrb.gmra.mxu3 %v1495_v29  ;;  %1694 = vmatmul.bf16.vlgmr.msra.gmra.mxu2 %v1636_v45 }
 0x29f   :  { %1775 = vmatmul.bf16.vlgmr.msra.gmra.mxu1 %v1717_v12 }
 0x315   :  { %v1615_v43 = vpop.f32.mrf.mxu0 }
 0x31c   :  { %v1776_v44 = vpop.f32.mrf.mxu1 }
 0x31d   :  { %v1617_v5 = vpop.f32.mrf.mxu0 }
 0x321   :  { %v1554_v46 = vpop.f32.mrf.mxu3  ;;  %v1695_v27 = vpop.f32.mrf.mxu2 }
 0x322   :  { %v1616_v49 = vadd.f32 %v1615_v43, %v1554_v46 }
 0x324   :  { %v1699_v54 = vadd.f32 %v1695_v27, %v1616_v49  ;;  %v1778_v50 = vpop.f32.mrf.mxu1 }
 0x326   :  { %v1780_v51 = vadd.f32 %v1776_v44, %v1699_v54 }
 0x328   :  { %v1785_v52 = vadd.f32 %v2977_v55, %v1780_v51 }
 0x329   :  { %v1556_v1 = vpop.f32.mrf.mxu3  ;;  %v1697_v53 = vpop.f32.mrf.mxu2 }
 0x32a   :  { %v1786_v56 = vmax.f32 %v1785_v52, 0.0 }
 0x32c   :  { %v1787_v2 = vpack.c.bf16 %v1786_v56, %v1786_v56 }
 0x32e   :  { %1864 = vmatmul.bf16.vlgmr.msra.gmra.mxu3 %v1787_v2 }
 0x3b1   :  { %v1865_v37 = vpop.f32.mrf.mxu3 }
 0x3b2   :  { %v1866_v47 = vadd.f32 %v2978_v14, %v1865_v37 }
 0x3b4   :  { %1869 = vst [vmem:[#allocation2] sm:$0x3] %v1866_v47 }
 0x3b5   :  { %1880 = dma.vmem_to_hbm [thread:$0]  %s1876_s16, 32, %s1878_s19, [#allocation3]  }
 0x3b9   :  { %v1867_v59 = vpop.f32.mrf.mxu3 }
 0x3ba   :  { %3003 = dma.done.wait [#allocation3], 32  }
 0x3bb   :  { %3004 = vsyncadd [#allocation3], 4294967264 }
 0x3bc   :  { %1885 = vsyncpa [#allocation3], 1 }

</bundles_post_ra>
